<compile_context>
chip_gen: v6e
topology: v6e:2x2x1
jax: 0.10.0
libtpu: 0.0.40
codegen_flags: <defaults>
</compile_context>

<pallas_src>
import functools
import math

import jax
import jax.numpy as jnp
from jax.experimental import pallas as pl
from jax.experimental.pallas import tpu as pltpu


def _make_lstm_kernel(num_layers: int, seq_len: int, batch_pad: int, hidden_dim: int):
    """Builds the Pallas kernel body for a stacked LSTM + final Linear."""
    H = hidden_dim
    T = seq_len
    B = batch_pad  # padded to a multiple of 8 (sublane count)

    def kernel(*refs):
        # refs: x, (wih_t, whh_t, b) * num_layers, wfc_t, bfc, out
        x_ref = refs[0]                               # (T*B, D) time-major, flattened
        layer_refs = refs[1:1 + 3 * num_layers]
        wfc_ref, bfc_ref, out_ref = refs[1 + 3 * num_layers:]

        # Layer-0 input sequence as a value; subsequent layers consume the
        # value-carried hidden sequence of the previous layer.
        seq_in = x_ref[...]                           # (T*B, D)
        h_last = None
        for layer in range(num_layers):
            wih = layer_refs[3 * layer][...]          # (D_in, 4H) gate order [i,f,o,g]
            whh = layer_refs[3 * layer + 1][...]      # (H, 4H)
            b = layer_refs[3 * layer + 2][...]        # (1, 4H)   (= b_ih + b_hh)

            # --- Hoisted input projection: one MXU matmul for all T steps,
            #     result kept in vregs (no VMEM scratch round-trip).
            gx = jnp.dot(seq_in, wih, preferred_element_type=jnp.float32) + b  # (T*B,4H)

            # --- Serial recurrence: h/c live in vregs; per step only the
            #     small (B,H)x(H,4H) recurrent matmul + gate math.
            #     Statically unrolled (T small, static).
            # TODO(synk): for long T / big H switch to lax.fori_loop carries,
            #             pl.ds slices, and VMEM-resident sequence buffers.
            h = jnp.zeros((B, H), jnp.float32)
            c = jnp.zeros((B, H), jnp.float32)
            hs = []
            for t in range(T):
                gates = gx[t * B:(t + 1) * B, :] + jnp.dot(
                    h, whh, preferred_element_type=jnp.float32)       # (B, 4H)
                sig = jax.nn.sigmoid(gates[:, :3 * H])                # fused i|f|o
                i_g = sig[:, 0 * H:1 * H]
                f_g = sig[:, 1 * H:2 * H]
                o_g = sig[:, 2 * H:3 * H]
                g_g = jnp.tanh(gates[:, 3 * H:4 * H])
                c = f_g * c + i_g * g_g
                h = o_g * jnp.tanh(c)
                hs.append(h)
            h_last = h
            if layer < num_layers - 1:
                # Feed the next layer directly from values: zero per-step
                # stores, one sublane-aligned concat.
                seq_in = jnp.concatenate(hs, axis=0)  # (T*B, H)

        # fc(out[:, -1, :]) == fc(h of last layer at the final time step).
        # Output is (B_pad, O_pad): one dense vreg store.
        out_ref[...] = (
            jnp.dot(h_last, wfc_ref[...], preferred_element_type=jnp.float32)
            + bfc_ref[...]
        )

    return kernel


def _reorder_gates_ifgo_to_ifog(w, axis):
    """Permute PyTorch gate blocks [i,f,g,o] -> [i,f,o,g] along `axis`."""
    i, f, g, o = jnp.split(w, 4, axis=axis)
    return jnp.concatenate([i, f, o, g], axis=axis)


def _padded_bytes(shape, dtype):
    """(8,128)-tile padded VMEM footprint of an array."""
    itemsize = jnp.dtype(dtype).itemsize
    dims = list(shape)
    if not dims:
        return itemsize
    dims[-1] = math.ceil(dims[-1] / 128) * 128
    if len(dims) >= 2:
        dims[-2] = math.ceil(dims[-2] / 8) * 8
    n = 1
    for d in dims:
        n *= int(d)
    return n * itemsize


def _vmem_capacity_bytes():
    """Physical VMEM capacity of the current chip, with a safe fallback."""
    try:
        info = pltpu.get_tpu_info()
        cap = int(getattr(info, "vmem_capacity_bytes", 64 << 20))
        if cap > 0:
            return cap
    except Exception:
        pass
    return 64 << 20  # conservative (v7x-sized) fallback


def lstm_model_forward(x_btd, params, *, num_layers, hidden_dim):
    """x_btd: (B, T, D) float32, batch-first like PyTorch. Returns (B, O)."""
    B, T, D = x_btd.shape
    H = hidden_dim
    O = params["wfc_t"].shape[1]

    # Pad batch to the 8-sublane tile and output lanes to 128 so every slice
    # and the final store are tile-aligned (extra rows/cols are zeros and are
    # sliced away at the end).
    B_pad = max(8, ((B + 7) // 8) * 8)
    O_pad = max(128, ((O + 127) // 128) * 128)

    x_pad = jnp.zeros((B_pad, T, D), jnp.float32).at[:B].set(x_btd)
    # Time-major and flattened so each layer's input projection is ONE matmul
    # and every per-step row block starts on an 8-sublane boundary.
    x_flat = jnp.transpose(x_pad, (1, 0, 2)).reshape(T * B_pad, D)

    inputs = [x_flat]
    for l in range(num_layers):
        inputs += [
            _reorder_gates_ifgo_to_ifog(params["wih_t"][l], axis=1),
            _reorder_gates_ifgo_to_ifog(params["whh_t"][l], axis=1),
            _reorder_gates_ifgo_to_ifog(params["b"][l], axis=1),
        ]
    wfc_pad = jnp.zeros((H, O_pad), jnp.float32).at[:, :O].set(params["wfc_t"])
    bfc_pad = jnp.zeros((1, O_pad), jnp.float32).at[:, :O].set(params["bfc"])
    inputs += [wfc_pad, bfc_pad]

    # VMEM budget: padded inputs/output plus slack, capped at ~80% of the
    # chip's physical VMEM (no hard 64 MiB assumption).
    vmem_bytes = sum(_padded_bytes(a.shape, a.dtype) for a in inputs)
    vmem_bytes += _padded_bytes((B_pad, O_pad), jnp.float32)
    vmem_cap = _vmem_capacity_bytes()
    vmem_limit = int(min(max(4 * vmem_bytes + (2 << 20), 16 << 20),
                         int(0.8 * vmem_cap)))

    # Advisory cost estimate for XLA scheduling around the custom call.
    flops = 0
    for l in range(num_layers):
        d_in = D if l == 0 else H
        flops += 2 * T * B_pad * d_in * 4 * H      # hoisted input projection
        flops += 2 * T * B_pad * H * 4 * H         # recurrent matmuls
        flops += 10 * T * B_pad * H                # gate elementwise
    flops += 2 * B_pad * H * O_pad
    transcendentals = num_layers * T * B_pad * 5 * H   # 3H sigmoid + 2H tanh
    bytes_accessed = int(
        sum(int(a.size) * jnp.dtype(a.dtype).itemsize for a in inputs)
        + B_pad * O_pad * 4
    )

    kernel = _make_lstm_kernel(num_layers, T, B_pad, H)
    vmem = pl.BlockSpec(memory_space=pltpu.MemorySpace.VMEM)

    out_pad = pl.pallas_call(
        kernel,
        out_shape=jax.ShapeDtypeStruct((B_pad, O_pad), jnp.float32),
        in_specs=[vmem] * len(inputs),
        out_specs=vmem,
        compiler_params=pltpu.CompilerParams(vmem_limit_bytes=vmem_limit),
        cost_estimate=pl.CostEstimate(
            flops=int(flops),
            transcendentals=int(transcendentals),
            bytes_accessed=bytes_accessed,
        ),
    )(*inputs)

    return out_pad[:B, :O]


def init_params(key, input_dim, hidden_dim, num_layers, output_dim):
    """Deterministic init mirroring nn.LSTM / nn.Linear shapes (U(-k, k)).

    Weights are stored transposed in PyTorch gate order [i, f, g, o]; the
    wrapper permutes columns to the kernel's [i, f, o, g] layout.
    """
    H = hidden_dim
    k_lstm = 1.0 / jnp.sqrt(jnp.float32(H))
    wih_t, whh_t, b = [], [], []
    keys = jax.random.split(key, 4 * num_layers + 2)
    for l in range(num_layers):
        d_in = input_dim if l == 0 else H
        w_ih = jax.random.uniform(keys[4 * l + 0], (4 * H, d_in),
                                  minval=-k_lstm, maxval=k_lstm, dtype=jnp.float32)
        w_hh = jax.random.uniform(keys[4 * l + 1], (4 * H, H),
                                  minval=-k_lstm, maxval=k_lstm, dtype=jnp.float32)
        b_ih = jax.random.uniform(keys[4 * l + 2], (4 * H,),
                                  minval=-k_lstm, maxval=k_lstm, dtype=jnp.float32)
        b_hh = jax.random.uniform(keys[4 * l + 3], (4 * H,),
                                  minval=-k_lstm, maxval=k_lstm, dtype=jnp.float32)
        wih_t.append(w_ih.T)                       # (d_in, 4H)
        whh_t.append(w_hh.T)                       # (H, 4H)
        b.append((b_ih + b_hh).reshape(1, 4 * H))  # combined bias
    k_fc = 1.0 / jnp.sqrt(jnp.float32(H))
    w_fc = jax.random.uniform(keys[-2], (output_dim, H),
                              minval=-k_fc, maxval=k_fc, dtype=jnp.float32)
    b_fc = jax.random.uniform(keys[-1], (output_dim,),
                              minval=-k_fc, maxval=k_fc, dtype=jnp.float32)
    return {
        "wih_t": wih_t,
        "whh_t": whh_t,
        "b": b,
        "wfc_t": w_fc.T,                 # (H, O)
        "bfc": b_fc.reshape(1, output_dim),
    }


def reference_forward(x_btd, params, *, num_layers, hidden_dim):
    """Pure-JAX reference matching PyTorch LSTM semantics (gate order [i,f,g,o])."""
    B, T, _ = x_btd.shape
    H = hidden_dim
    seq = x_btd
    for l in range(num_layers):
        h = jnp.zeros((B, H), jnp.float32)
        c = jnp.zeros((B, H), jnp.float32)
        outs = []
        for t in range(T):
            gates = seq[:, t, :] @ params["wih_t"][l] + h @ params["whh_t"][l] + params["b"][l]
            i_g = jax.nn.sigmoid(gates[:, 0 * H:1 * H])
            f_g = jax.nn.sigmoid(gates[:, 1 * H:2 * H])
            g_g = jnp.tanh(gates[:, 2 * H:3 * H])
            o_g = jax.nn.sigmoid(gates[:, 3 * H:4 * H])
            c = f_g * c + i_g * g_g
            h = o_g * jnp.tanh(c)
            outs.append(h)
        seq = jnp.stack(outs, axis=1)
    return seq[:, -1, :] @ params["wfc_t"] + params["bfc"]


if __name__ == "__main__":
    B, T = 2, 8
    input_dim, hidden_dim, num_layers, output_dim = 16, 32, 2, 4

    key = jax.random.PRNGKey(0)
    k_x, k_p = jax.random.split(key)
    x = jax.random.normal(k_x, (B, T, input_dim), dtype=jnp.float32)
    params = init_params(k_p, input_dim, hidden_dim, num_layers, output_dim)

    fwd = jax.jit(functools.partial(lstm_model_forward,
                                    num_layers=num_layers, hidden_dim=hidden_dim))
    out = jax.block_until_ready(fwd(x, params))

    ref = reference_forward(x, params, num_layers=num_layers, hidden_dim=hidden_dim)
    assert out.shape == (B, output_dim)
    assert jnp.allclose(out, ref, atol=1e-4, rtol=1e-4), (out, ref)

    print("KERNEL_OK")
</pallas_src>

<mosaic_0001>
module attributes {stable_mosaic.version = 11 : i64} {
  func.func @kernel(%arg0: memref<64x16xf32, #tpu.memory_space<vmem>>, %arg1: memref<16x128xf32, #tpu.memory_space<vmem>>, %arg2: memref<32x128xf32, #tpu.memory_space<vmem>>, %arg3: memref<1x128xf32, #tpu.memory_space<vmem>>, %arg4: memref<32x128xf32, #tpu.memory_space<vmem>>, %arg5: memref<32x128xf32, #tpu.memory_space<vmem>>, %arg6: memref<1x128xf32, #tpu.memory_space<vmem>>, %arg7: memref<32x128xf32, #tpu.memory_space<vmem>>, %arg8: memref<1x128xf32, #tpu.memory_space<vmem>>, %arg9: memref<8x128xf32, #tpu.memory_space<vmem>>) attributes {dimension_semantics = [], scalar_prefetch = 0 : i64, scratch_operands = 0 : i64, tpu.core_type = #tpu.core_type<tc>} {
    %c0 = arith.constant 0 : index
    %c0_0 = arith.constant 0 : index
    %0 = vector.load %arg0[%c0, %c0_0] : memref<64x16xf32, #tpu.memory_space<vmem>>, vector<64x16xf32>
    %c0_1 = arith.constant 0 : index
    %c0_2 = arith.constant 0 : index
    %1 = vector.load %arg1[%c0_1, %c0_2] : memref<16x128xf32, #tpu.memory_space<vmem>>, vector<16x128xf32>
    %c0_3 = arith.constant 0 : index
    %c0_4 = arith.constant 0 : index
    %2 = vector.load %arg2[%c0_3, %c0_4] : memref<32x128xf32, #tpu.memory_space<vmem>>, vector<32x128xf32>
    %c0_5 = arith.constant 0 : index
    %c0_6 = arith.constant 0 : index
    %3 = vector.load %arg3[%c0_5, %c0_6] : memref<1x128xf32, #tpu.memory_space<vmem>>, vector<1x128xf32>
    %cst = arith.constant dense<0.000000e+00> : vector<64x128xf32>
    %4 = tpu.matmul %0, %1, %cst {dimension_numbers = #tpu.dot_dimension_numbers<[1], [0], [0], [1], [0, 0, 1, 1], [], []>} : vector<64x16xf32>, vector<16x128xf32>, vector<64x128xf32> -> vector<64x128xf32>
    %5 = vector.broadcast %3 : vector<1x128xf32> to vector<64x128xf32>
    %6 = arith.addf %4, %5 : vector<64x128xf32>
    %cst_7 = arith.constant 0.000000e+00 : f32
    %7 = vector.broadcast %cst_7 : f32 to vector<8x32xf32>
    %cst_8 = arith.constant 0.000000e+00 : f32
    %8 = vector.broadcast %cst_8 : f32 to vector<8x32xf32>
    %9 = vector.extract_strided_slice %6 {offsets = [0, 0], sizes = [8, 128], strides = [1, 1]} : vector<64x128xf32> to vector<8x128xf32>
    %cst_9 = arith.constant dense<0.000000e+00> : vector<8x128xf32>
    %10 = tpu.matmul %7, %2, %cst_9 {dimension_numbers = #tpu.dot_dimension_numbers<[1], [0], [0], [1], [0, 0, 1, 1], [], []>} : vector<8x32xf32>, vector<32x128xf32>, vector<8x128xf32> -> vector<8x128xf32>
    %11 = arith.addf %9, %10 : vector<8x128xf32>
    %12 = vector.extract_strided_slice %11 {offsets = [0, 0], sizes = [8, 96], strides = [1, 1]} : vector<8x128xf32> to vector<8x96xf32>
    %13 = arith.negf %12 : vector<8x96xf32>
    %14 = math.exp %13 : vector<8x96xf32>
    %cst_10 = arith.constant 1.000000e+00 : f32
    %15 = vector.broadcast %cst_10 : f32 to vector<8x96xf32>
    %16 = arith.addf %15, %14 : vector<8x96xf32>
    %17 = arith.divf %15, %16 : vector<8x96xf32>
    %18 = vector.extract_strided_slice %17 {offsets = [0, 0], sizes = [8, 32], strides = [1, 1]} : vector<8x96xf32> to vector<8x32xf32>
    %19 = vector.extract_strided_slice %17 {offsets = [0, 32], sizes = [8, 32], strides = [1, 1]} : vector<8x96xf32> to vector<8x32xf32>
    %20 = vector.extract_strided_slice %17 {offsets = [0, 64], sizes = [8, 32], strides = [1, 1]} : vector<8x96xf32> to vector<8x32xf32>
    %21 = vector.extract_strided_slice %11 {offsets = [0, 96], sizes = [8, 32], strides = [1, 1]} : vector<8x128xf32> to vector<8x32xf32>
    %22 = math.tanh %21 : vector<8x32xf32>
    %23 = arith.mulf %19, %8 : vector<8x32xf32>
    %24 = arith.mulf %18, %22 : vector<8x32xf32>
    %25 = arith.addf %23, %24 : vector<8x32xf32>
    %26 = math.tanh %25 : vector<8x32xf32>
    %27 = arith.mulf %20, %26 : vector<8x32xf32>
    %28 = vector.extract_strided_slice %6 {offsets = [8, 0], sizes = [8, 128], strides = [1, 1]} : vector<64x128xf32> to vector<8x128xf32>
    %cst_11 = arith.constant dense<0.000000e+00> : vector<8x128xf32>
    %29 = tpu.matmul %27, %2, %cst_11 {dimension_numbers = #tpu.dot_dimension_numbers<[1], [0], [0], [1], [0, 0, 1, 1], [], []>} : vector<8x32xf32>, vector<32x128xf32>, vector<8x128xf32> -> vector<8x128xf32>
    %30 = arith.addf %28, %29 : vector<8x128xf32>
    %31 = vector.extract_strided_slice %30 {offsets = [0, 0], sizes = [8, 96], strides = [1, 1]} : vector<8x128xf32> to vector<8x96xf32>
    %32 = arith.negf %31 : vector<8x96xf32>
    %33 = math.exp %32 : vector<8x96xf32>
    %cst_12 = arith.constant 1.000000e+00 : f32
    %34 = vector.broadcast %cst_12 : f32 to vector<8x96xf32>
    %35 = arith.addf %34, %33 : vector<8x96xf32>
    %36 = arith.divf %34, %35 : vector<8x96xf32>
    %37 = vector.extract_strided_slice %36 {offsets = [0, 0], sizes = [8, 32], strides = [1, 1]} : vector<8x96xf32> to vector<8x32xf32>
    %38 = vector.extract_strided_slice %36 {offsets = [0, 32], sizes = [8, 32], strides = [1, 1]} : vector<8x96xf32> to vector<8x32xf32>
    %39 = vector.extract_strided_slice %36 {offsets = [0, 64], sizes = [8, 32], strides = [1, 1]} : vector<8x96xf32> to vector<8x32xf32>
    %40 = vector.extract_strided_slice %30 {offsets = [0, 96], sizes = [8, 32], strides = [1, 1]} : vector<8x128xf32> to vector<8x32xf32>
    %41 = math.tanh %40 : vector<8x32xf32>
    %42 = arith.mulf %38, %25 : vector<8x32xf32>
    %43 = arith.mulf %37, %41 : vector<8x32xf32>
    %44 = arith.addf %42, %43 : vector<8x32xf32>
    %45 = math.tanh %44 : vector<8x32xf32>
    %46 = arith.mulf %39, %45 : vector<8x32xf32>
    %47 = vector.extract_strided_slice %6 {offsets = [16, 0], sizes = [8, 128], strides = [1, 1]} : vector<64x128xf32> to vector<8x128xf32>
    %cst_13 = arith.constant dense<0.000000e+00> : vector<8x128xf32>
    %48 = tpu.matmul %46, %2, %cst_13 {dimension_numbers = #tpu.dot_dimension_numbers<[1], [0], [0], [1], [0, 0, 1, 1], [], []>} : vector<8x32xf32>, vector<32x128xf32>, vector<8x128xf32> -> vector<8x128xf32>
    %49 = arith.addf %47, %48 : vector<8x128xf32>
    %50 = vector.extract_strided_slice %49 {offsets = [0, 0], sizes = [8, 96], strides = [1, 1]} : vector<8x128xf32> to vector<8x96xf32>
    %51 = arith.negf %50 : vector<8x96xf32>
    %52 = math.exp %51 : vector<8x96xf32>
    %cst_14 = arith.constant 1.000000e+00 : f32
    %53 = vector.broadcast %cst_14 : f32 to vector<8x96xf32>
    %54 = arith.addf %53, %52 : vector<8x96xf32>
    %55 = arith.divf %53, %54 : vector<8x96xf32>
    %56 = vector.extract_strided_slice %55 {offsets = [0, 0], sizes = [8, 32], strides = [1, 1]} : vector<8x96xf32> to vector<8x32xf32>
    %57 = vector.extract_strided_slice %55 {offsets = [0, 32], sizes = [8, 32], strides = [1, 1]} : vector<8x96xf32> to vector<8x32xf32>
    %58 = vector.extract_strided_slice %55 {offsets = [0, 64], sizes = [8, 32], strides = [1, 1]} : vector<8x96xf32> to vector<8x32xf32>
    %59 = vector.extract_strided_slice %49 {offsets = [0, 96], sizes = [8, 32], strides = [1, 1]} : vector<8x128xf32> to vector<8x32xf32>
    %60 = math.tanh %59 : vector<8x32xf32>
    %61 = arith.mulf %57, %44 : vector<8x32xf32>
    %62 = arith.mulf %56, %60 : vector<8x32xf32>
    %63 = arith.addf %61, %62 : vector<8x32xf32>
    %64 = math.tanh %63 : vector<8x32xf32>
    %65 = arith.mulf %58, %64 : vector<8x32xf32>
    %66 = vector.extract_strided_slice %6 {offsets = [24, 0], sizes = [8, 128], strides = [1, 1]} : vector<64x128xf32> to vector<8x128xf32>
    %cst_15 = arith.constant dense<0.000000e+00> : vector<8x128xf32>
    %67 = tpu.matmul %65, %2, %cst_15 {dimension_numbers = #tpu.dot_dimension_numbers<[1], [0], [0], [1], [0, 0, 1, 1], [], []>} : vector<8x32xf32>, vector<32x128xf32>, vector<8x128xf32> -> vector<8x128xf32>
    %68 = arith.addf %66, %67 : vector<8x128xf32>
    %69 = vector.extract_strided_slice %68 {offsets = [0, 0], sizes = [8, 96], strides = [1, 1]} : vector<8x128xf32> to vector<8x96xf32>
    %70 = arith.negf %69 : vector<8x96xf32>
    %71 = math.exp %70 : vector<8x96xf32>
    %cst_16 = arith.constant 1.000000e+00 : f32
    %72 = vector.broadcast %cst_16 : f32 to vector<8x96xf32>
    %73 = arith.addf %72, %71 : vector<8x96xf32>
    %74 = arith.divf %72, %73 : vector<8x96xf32>
    %75 = vector.extract_strided_slice %74 {offsets = [0, 0], sizes = [8, 32], strides = [1, 1]} : vector<8x96xf32> to vector<8x32xf32>
    %76 = vector.extract_strided_slice %74 {offsets = [0, 32], sizes = [8, 32], strides = [1, 1]} : vector<8x96xf32> to vector<8x32xf32>
    %77 = vector.extract_strided_slice %74 {offsets = [0, 64], sizes = [8, 32], strides = [1, 1]} : vector<8x96xf32> to vector<8x32xf32>
    %78 = vector.extract_strided_slice %68 {offsets = [0, 96], sizes = [8, 32], strides = [1, 1]} : vector<8x128xf32> to vector<8x32xf32>
    %79 = math.tanh %78 : vector<8x32xf32>
    %80 = arith.mulf %76, %63 : vector<8x32xf32>
    %81 = arith.mulf %75, %79 : vector<8x32xf32>
    %82 = arith.addf %80, %81 : vector<8x32xf32>
    %83 = math.tanh %82 : vector<8x32xf32>
    %84 = arith.mulf %77, %83 : vector<8x32xf32>
    %85 = vector.extract_strided_slice %6 {offsets = [32, 0], sizes = [8, 128], strides = [1, 1]} : vector<64x128xf32> to vector<8x128xf32>
    %cst_17 = arith.constant dense<0.000000e+00> : vector<8x128xf32>
    %86 = tpu.matmul %84, %2, %cst_17 {dimension_numbers = #tpu.dot_dimension_numbers<[1], [0], [0], [1], [0, 0, 1, 1], [], []>} : vector<8x32xf32>, vector<32x128xf32>, vector<8x128xf32> -> vector<8x128xf32>
    %87 = arith.addf %85, %86 : vector<8x128xf32>
    %88 = vector.extract_strided_slice %87 {offsets = [0, 0], sizes = [8, 96], strides = [1, 1]} : vector<8x128xf32> to vector<8x96xf32>
    %89 = arith.negf %88 : vector<8x96xf32>
    %90 = math.exp %89 : vector<8x96xf32>
    %cst_18 = arith.constant 1.000000e+00 : f32
    %91 = vector.broadcast %cst_18 : f32 to vector<8x96xf32>
    %92 = arith.addf %91, %90 : vector<8x96xf32>
    %93 = arith.divf %91, %92 : vector<8x96xf32>
    %94 = vector.extract_strided_slice %93 {offsets = [0, 0], sizes = [8, 32], strides = [1, 1]} : vector<8x96xf32> to vector<8x32xf32>
    %95 = vector.extract_strided_slice %93 {offsets = [0, 32], sizes = [8, 32], strides = [1, 1]} : vector<8x96xf32> to vector<8x32xf32>
    %96 = vector.extract_strided_slice %93 {offsets = [0, 64], sizes = [8, 32], strides = [1, 1]} : vector<8x96xf32> to vector<8x32xf32>
    %97 = vector.extract_strided_slice %87 {offsets = [0, 96], sizes = [8, 32], strides = [1, 1]} : vector<8x128xf32> to vector<8x32xf32>
    %98 = math.tanh %97 : vector<8x32xf32>
    %99 = arith.mulf %95, %82 : vector<8x32xf32>
    %100 = arith.mulf %94, %98 : vector<8x32xf32>
    %101 = arith.addf %99, %100 : vector<8x32xf32>
    %102 = math.tanh %101 : vector<8x32xf32>
    %103 = arith.mulf %96, %102 : vector<8x32xf32>
    %104 = vector.extract_strided_slice %6 {offsets = [40, 0], sizes = [8, 128], strides = [1, 1]} : vector<64x128xf32> to vector<8x128xf32>
    %cst_19 = arith.constant dense<0.000000e+00> : vector<8x128xf32>
    %105 = tpu.matmul %103, %2, %cst_19 {dimension_numbers = #tpu.dot_dimension_numbers<[1], [0], [0], [1], [0, 0, 1, 1], [], []>} : vector<8x32xf32>, vector<32x128xf32>, vector<8x128xf32> -> vector<8x128xf32>
    %106 = arith.addf %104, %105 : vector<8x128xf32>
    %107 = vector.extract_strided_slice %106 {offsets = [0, 0], sizes = [8, 96], strides = [1, 1]} : vector<8x128xf32> to vector<8x96xf32>
    %108 = arith.negf %107 : vector<8x96xf32>
    %109 = math.exp %108 : vector<8x96xf32>
    %cst_20 = arith.constant 1.000000e+00 : f32
    %110 = vector.broadcast %cst_20 : f32 to vector<8x96xf32>
    %111 = arith.addf %110, %109 : vector<8x96xf32>
    %112 = arith.divf %110, %111 : vector<8x96xf32>
    %113 = vector.extract_strided_slice %112 {offsets = [0, 0], sizes = [8, 32], strides = [1, 1]} : vector<8x96xf32> to vector<8x32xf32>
    %114 = vector.extract_strided_slice %112 {offsets = [0, 32], sizes = [8, 32], strides = [1, 1]} : vector<8x96xf32> to vector<8x32xf32>
    %115 = vector.extract_strided_slice %112 {offsets = [0, 64], sizes = [8, 32], strides = [1, 1]} : vector<8x96xf32> to vector<8x32xf32>
    %116 = vector.extract_strided_slice %106 {offsets = [0, 96], sizes = [8, 32], strides = [1, 1]} : vector<8x128xf32> to vector<8x32xf32>
    %117 = math.tanh %116 : vector<8x32xf32>
    %118 = arith.mulf %114, %101 : vector<8x32xf32>
    %119 = arith.mulf %113, %117 : vector<8x32xf32>
    %120 = arith.addf %118, %119 : vector<8x32xf32>
    %121 = math.tanh %120 : vector<8x32xf32>
    %122 = arith.mulf %115, %121 : vector<8x32xf32>
    %123 = vector.extract_strided_slice %6 {offsets = [48, 0], sizes = [8, 128], strides = [1, 1]} : vector<64x128xf32> to vector<8x128xf32>
    %cst_21 = arith.constant dense<0.000000e+00> : vector<8x128xf32>
    %124 = tpu.matmul %122, %2, %cst_21 {dimension_numbers = #tpu.dot_dimension_numbers<[1], [0], [0], [1], [0, 0, 1, 1], [], []>} : vector<8x32xf32>, vector<32x128xf32>, vector<8x128xf32> -> vector<8x128xf32>
    %125 = arith.addf %123, %124 : vector<8x128xf32>
    %126 = vector.extract_strided_slice %125 {offsets = [0, 0], sizes = [8, 96], strides = [1, 1]} : vector<8x128xf32> to vector<8x96xf32>
    %127 = arith.negf %126 : vector<8x96xf32>
    %128 = math.exp %127 : vector<8x96xf32>
    %cst_22 = arith.constant 1.000000e+00 : f32
    %129 = vector.broadcast %cst_22 : f32 to vector<8x96xf32>
    %130 = arith.addf %129, %128 : vector<8x96xf32>
    %131 = arith.divf %129, %130 : vector<8x96xf32>
    %132 = vector.extract_strided_slice %131 {offsets = [0, 0], sizes = [8, 32], strides = [1, 1]} : vector<8x96xf32> to vector<8x32xf32>
    %133 = vector.extract_strided_slice %131 {offsets = [0, 32], sizes = [8, 32], strides = [1, 1]} : vector<8x96xf32> to vector<8x32xf32>
    %134 = vector.extract_strided_slice %131 {offsets = [0, 64], sizes = [8, 32], strides = [1, 1]} : vector<8x96xf32> to vector<8x32xf32>
    %135 = vector.extract_strided_slice %125 {offsets = [0, 96], sizes = [8, 32], strides = [1, 1]} : vector<8x128xf32> to vector<8x32xf32>
    %136 = math.tanh %135 : vector<8x32xf32>
    %137 = arith.mulf %133, %120 : vector<8x32xf32>
    %138 = arith.mulf %132, %136 : vector<8x32xf32>
    %139 = arith.addf %137, %138 : vector<8x32xf32>
    %140 = math.tanh %139 : vector<8x32xf32>
    %141 = arith.mulf %134, %140 : vector<8x32xf32>
    %142 = vector.extract_strided_slice %6 {offsets = [56, 0], sizes = [8, 128], strides = [1, 1]} : vector<64x128xf32> to vector<8x128xf32>
    %cst_23 = arith.constant dense<0.000000e+00> : vector<8x128xf32>
    %143 = tpu.matmul %141, %2, %cst_23 {dimension_numbers = #tpu.dot_dimension_numbers<[1], [0], [0], [1], [0, 0, 1, 1], [], []>} : vector<8x32xf32>, vector<32x128xf32>, vector<8x128xf32> -> vector<8x128xf32>
    %144 = arith.addf %142, %143 : vector<8x128xf32>
    %145 = vector.extract_strided_slice %144 {offsets = [0, 0], sizes = [8, 96], strides = [1, 1]} : vector<8x128xf32> to vector<8x96xf32>
    %146 = arith.negf %145 : vector<8x96xf32>
    %147 = math.exp %146 : vector<8x96xf32>
    %cst_24 = arith.constant 1.000000e+00 : f32
    %148 = vector.broadcast %cst_24 : f32 to vector<8x96xf32>
    %149 = arith.addf %148, %147 : vector<8x96xf32>
    %150 = arith.divf %148, %149 : vector<8x96xf32>
    %151 = vector.extract_strided_slice %150 {offsets = [0, 0], sizes = [8, 32], strides = [1, 1]} : vector<8x96xf32> to vector<8x32xf32>
    %152 = vector.extract_strided_slice %150 {offsets = [0, 32], sizes = [8, 32], strides = [1, 1]} : vector<8x96xf32> to vector<8x32xf32>
    %153 = vector.extract_strided_slice %150 {offsets = [0, 64], sizes = [8, 32], strides = [1, 1]} : vector<8x96xf32> to vector<8x32xf32>
    %154 = vector.extract_strided_slice %144 {offsets = [0, 96], sizes = [8, 32], strides = [1, 1]} : vector<8x128xf32> to vector<8x32xf32>
    %155 = math.tanh %154 : vector<8x32xf32>
    %156 = arith.mulf %152, %139 : vector<8x32xf32>
    %157 = arith.mulf %151, %155 : vector<8x32xf32>
    %158 = arith.addf %156, %157 : vector<8x32xf32>
    %159 = math.tanh %158 : vector<8x32xf32>
    %160 = arith.mulf %153, %159 : vector<8x32xf32>
    %161 = tpu.concatenate %27, %46, %65, %84, %103, %122, %141, %160 in 0 : vector<8x32xf32>, vector<8x32xf32>, vector<8x32xf32>, vector<8x32xf32>, vector<8x32xf32>, vector<8x32xf32>, vector<8x32xf32>, vector<8x32xf32> -> vector<64x32xf32>
    %c0_25 = arith.constant 0 : index
    %c0_26 = arith.constant 0 : index
    %162 = vector.load %arg4[%c0_25, %c0_26] : memref<32x128xf32, #tpu.memory_space<vmem>>, vector<32x128xf32>
    %c0_27 = arith.constant 0 : index
    %c0_28 = arith.constant 0 : index
    %163 = vector.load %arg5[%c0_27, %c0_28] : memref<32x128xf32, #tpu.memory_space<vmem>>, vector<32x128xf32>
    %c0_29 = arith.constant 0 : index
    %c0_30 = arith.constant 0 : index
    %164 = vector.load %arg6[%c0_29, %c0_30] : memref<1x128xf32, #tpu.memory_space<vmem>>, vector<1x128xf32>
    %cst_31 = arith.constant dense<0.000000e+00> : vector<64x128xf32>
    %165 = tpu.matmul %161, %162, %cst_31 {dimension_numbers = #tpu.dot_dimension_numbers<[1], [0], [0], [1], [0, 0, 1, 1], [], []>} : vector<64x32xf32>, vector<32x128xf32>, vector<64x128xf32> -> vector<64x128xf32>
    %166 = vector.broadcast %164 : vector<1x128xf32> to vector<64x128xf32>
    %167 = arith.addf %165, %166 : vector<64x128xf32>
    %cst_32 = arith.constant 0.000000e+00 : f32
    %168 = vector.broadcast %cst_32 : f32 to vector<8x32xf32>
    %cst_33 = arith.constant 0.000000e+00 : f32
    %169 = vector.broadcast %cst_33 : f32 to vector<8x32xf32>
    %170 = vector.extract_strided_slice %167 {offsets = [0, 0], sizes = [8, 128], strides = [1, 1]} : vector<64x128xf32> to vector<8x128xf32>
    %cst_34 = arith.constant dense<0.000000e+00> : vector<8x128xf32>
    %171 = tpu.matmul %168, %163, %cst_34 {dimension_numbers = #tpu.dot_dimension_numbers<[1], [0], [0], [1], [0, 0, 1, 1], [], []>} : vector<8x32xf32>, vector<32x128xf32>, vector<8x128xf32> -> vector<8x128xf32>
    %172 = arith.addf %170, %171 : vector<8x128xf32>
    %173 = vector.extract_strided_slice %172 {offsets = [0, 0], sizes = [8, 96], strides = [1, 1]} : vector<8x128xf32> to vector<8x96xf32>
    %174 = arith.negf %173 : vector<8x96xf32>
    %175 = math.exp %174 : vector<8x96xf32>
    %cst_35 = arith.constant 1.000000e+00 : f32
    %176 = vector.broadcast %cst_35 : f32 to vector<8x96xf32>
    %177 = arith.addf %176, %175 : vector<8x96xf32>
    %178 = arith.divf %176, %177 : vector<8x96xf32>
    %179 = vector.extract_strided_slice %178 {offsets = [0, 0], sizes = [8, 32], strides = [1, 1]} : vector<8x96xf32> to vector<8x32xf32>
    %180 = vector.extract_strided_slice %178 {offsets = [0, 32], sizes = [8, 32], strides = [1, 1]} : vector<8x96xf32> to vector<8x32xf32>
    %181 = vector.extract_strided_slice %178 {offsets = [0, 64], sizes = [8, 32], strides = [1, 1]} : vector<8x96xf32> to vector<8x32xf32>
    %182 = vector.extract_strided_slice %172 {offsets = [0, 96], sizes = [8, 32], strides = [1, 1]} : vector<8x128xf32> to vector<8x32xf32>
    %183 = math.tanh %182 : vector<8x32xf32>
    %184 = arith.mulf %180, %169 : vector<8x32xf32>
    %185 = arith.mulf %179, %183 : vector<8x32xf32>
    %186 = arith.addf %184, %185 : vector<8x32xf32>
    %187 = math.tanh %186 : vector<8x32xf32>
    %188 = arith.mulf %181, %187 : vector<8x32xf32>
    %189 = vector.extract_strided_slice %167 {offsets = [8, 0], sizes = [8, 128], strides = [1, 1]} : vector<64x128xf32> to vector<8x128xf32>
    %cst_36 = arith.constant dense<0.000000e+00> : vector<8x128xf32>
    %190 = tpu.matmul %188, %163, %cst_36 {dimension_numbers = #tpu.dot_dimension_numbers<[1], [0], [0], [1], [0, 0, 1, 1], [], []>} : vector<8x32xf32>, vector<32x128xf32>, vector<8x128xf32> -> vector<8x128xf32>
    %191 = arith.addf %189, %190 : vector<8x128xf32>
    %192 = vector.extract_strided_slice %191 {offsets = [0, 0], sizes = [8, 96], strides = [1, 1]} : vector<8x128xf32> to vector<8x96xf32>
    %193 = arith.negf %192 : vector<8x96xf32>
    %194 = math.exp %193 : vector<8x96xf32>
    %cst_37 = arith.constant 1.000000e+00 : f32
    %195 = vector.broadcast %cst_37 : f32 to vector<8x96xf32>
    %196 = arith.addf %195, %194 : vector<8x96xf32>
    %197 = arith.divf %195, %196 : vector<8x96xf32>
    %198 = vector.extract_strided_slice %197 {offsets = [0, 0], sizes = [8, 32], strides = [1, 1]} : vector<8x96xf32> to vector<8x32xf32>
    %199 = vector.extract_strided_slice %197 {offsets = [0, 32], sizes = [8, 32], strides = [1, 1]} : vector<8x96xf32> to vector<8x32xf32>
    %200 = vector.extract_strided_slice %197 {offsets = [0, 64], sizes = [8, 32], strides = [1, 1]} : vector<8x96xf32> to vector<8x32xf32>
    %201 = vector.extract_strided_slice %191 {offsets = [0, 96], sizes = [8, 32], strides = [1, 1]} : vector<8x128xf32> to vector<8x32xf32>
    %202 = math.tanh %201 : vector<8x32xf32>
    %203 = arith.mulf %199, %186 : vector<8x32xf32>
    %204 = arith.mulf %198, %202 : vector<8x32xf32>
    %205 = arith.addf %203, %204 : vector<8x32xf32>
    %206 = math.tanh %205 : vector<8x32xf32>
    %207 = arith.mulf %200, %206 : vector<8x32xf32>
    %208 = vector.extract_strided_slice %167 {offsets = [16, 0], sizes = [8, 128], strides = [1, 1]} : vector<64x128xf32> to vector<8x128xf32>
    %cst_38 = arith.constant dense<0.000000e+00> : vector<8x128xf32>
    %209 = tpu.matmul %207, %163, %cst_38 {dimension_numbers = #tpu.dot_dimension_numbers<[1], [0], [0], [1], [0, 0, 1, 1], [], []>} : vector<8x32xf32>, vector<32x128xf32>, vector<8x128xf32> -> vector<8x128xf32>
    %210 = arith.addf %208, %209 : vector<8x128xf32>
    %211 = vector.extract_strided_slice %210 {offsets = [0, 0], sizes = [8, 96], strides = [1, 1]} : vector<8x128xf32> to vector<8x96xf32>
    %212 = arith.negf %211 : vector<8x96xf32>
    %213 = math.exp %212 : vector<8x96xf32>
    %cst_39 = arith.constant 1.000000e+00 : f32
    %214 = vector.broadcast %cst_39 : f32 to vector<8x96xf32>
    %215 = arith.addf %214, %213 : vector<8x96xf32>
    %216 = arith.divf %214, %215 : vector<8x96xf32>
    %217 = vector.extract_strided_slice %216 {offsets = [0, 0], sizes = [8, 32], strides = [1, 1]} : vector<8x96xf32> to vector<8x32xf32>
    %218 = vector.extract_strided_slice %216 {offsets = [0, 32], sizes = [8, 32], strides = [1, 1]} : vector<8x96xf32> to vector<8x32xf32>
    %219 = vector.extract_strided_slice %216 {offsets = [0, 64], sizes = [8, 32], strides = [1, 1]} : vector<8x96xf32> to vector<8x32xf32>
    %220 = vector.extract_strided_slice %210 {offsets = [0, 96], sizes = [8, 32], strides = [1, 1]} : vector<8x128xf32> to vector<8x32xf32>
    %221 = math.tanh %220 : vector<8x32xf32>
    %222 = arith.mulf %218, %205 : vector<8x32xf32>
    %223 = arith.mulf %217, %221 : vector<8x32xf32>
    %224 = arith.addf %222, %223 : vector<8x32xf32>
    %225 = math.tanh %224 : vector<8x32xf32>
    %226 = arith.mulf %219, %225 : vector<8x32xf32>
    %227 = vector.extract_strided_slice %167 {offsets = [24, 0], sizes = [8, 128], strides = [1, 1]} : vector<64x128xf32> to vector<8x128xf32>
    %cst_40 = arith.constant dense<0.000000e+00> : vector<8x128xf32>
    %228 = tpu.matmul %226, %163, %cst_40 {dimension_numbers = #tpu.dot_dimension_numbers<[1], [0], [0], [1], [0, 0, 1, 1], [], []>} : vector<8x32xf32>, vector<32x128xf32>, vector<8x128xf32> -> vector<8x128xf32>
    %229 = arith.addf %227, %228 : vector<8x128xf32>
    %230 = vector.extract_strided_slice %229 {offsets = [0, 0], sizes = [8, 96], strides = [1, 1]} : vector<8x128xf32> to vector<8x96xf32>
    %231 = arith.negf %230 : vector<8x96xf32>
    %232 = math.exp %231 : vector<8x96xf32>
    %cst_41 = arith.constant 1.000000e+00 : f32
    %233 = vector.broadcast %cst_41 : f32 to vector<8x96xf32>
    %234 = arith.addf %233, %232 : vector<8x96xf32>
    %235 = arith.divf %233, %234 : vector<8x96xf32>
    %236 = vector.extract_strided_slice %235 {offsets = [0, 0], sizes = [8, 32], strides = [1, 1]} : vector<8x96xf32> to vector<8x32xf32>
    %237 = vector.extract_strided_slice %235 {offsets = [0, 32], sizes = [8, 32], strides = [1, 1]} : vector<8x96xf32> to vector<8x32xf32>
    %238 = vector.extract_strided_slice %235 {offsets = [0, 64], sizes = [8, 32], strides = [1, 1]} : vector<8x96xf32> to vector<8x32xf32>
    %239 = vector.extract_strided_slice %229 {offsets = [0, 96], sizes = [8, 32], strides = [1, 1]} : vector<8x128xf32> to vector<8x32xf32>
    %240 = math.tanh %239 : vector<8x32xf32>
    %241 = arith.mulf %237, %224 : vector<8x32xf32>
    %242 = arith.mulf %236, %240 : vector<8x32xf32>
    %243 = arith.addf %241, %242 : vector<8x32xf32>
    %244 = math.tanh %243 : vector<8x32xf32>
    %245 = arith.mulf %238, %244 : vector<8x32xf32>
    %246 = vector.extract_strided_slice %167 {offsets = [32, 0], sizes = [8, 128], strides = [1, 1]} : vector<64x128xf32> to vector<8x128xf32>
    %cst_42 = arith.constant dense<0.000000e+00> : vector<8x128xf32>
    %247 = tpu.matmul %245, %163, %cst_42 {dimension_numbers = #tpu.dot_dimension_numbers<[1], [0], [0], [1], [0, 0, 1, 1], [], []>} : vector<8x32xf32>, vector<32x128xf32>, vector<8x128xf32> -> vector<8x128xf32>
    %248 = arith.addf %246, %247 : vector<8x128xf32>
    %249 = vector.extract_strided_slice %248 {offsets = [0, 0], sizes = [8, 96], strides = [1, 1]} : vector<8x128xf32> to vector<8x96xf32>
    %250 = arith.negf %249 : vector<8x96xf32>
    %251 = math.exp %250 : vector<8x96xf32>
    %cst_43 = arith.constant 1.000000e+00 : f32
    %252 = vector.broadcast %cst_43 : f32 to vector<8x96xf32>
    %253 = arith.addf %252, %251 : vector<8x96xf32>
    %254 = arith.divf %252, %253 : vector<8x96xf32>
    %255 = vector.extract_strided_slice %254 {offsets = [0, 0], sizes = [8, 32], strides = [1, 1]} : vector<8x96xf32> to vector<8x32xf32>
    %256 = vector.extract_strided_slice %254 {offsets = [0, 32], sizes = [8, 32], strides = [1, 1]} : vector<8x96xf32> to vector<8x32xf32>
    %257 = vector.extract_strided_slice %254 {offsets = [0, 64], sizes = [8, 32], strides = [1, 1]} : vector<8x96xf32> to vector<8x32xf32>
    %258 = vector.extract_strided_slice %248 {offsets = [0, 96], sizes = [8, 32], strides = [1, 1]} : vector<8x128xf32> to vector<8x32xf32>
    %259 = math.tanh %258 : vector<8x32xf32>
    %260 = arith.mulf %256, %243 : vector<8x32xf32>
    %261 = arith.mulf %255, %259 : vector<8x32xf32>
    %262 = arith.addf %260, %261 : vector<8x32xf32>
    %263 = math.tanh %262 : vector<8x32xf32>
    %264 = arith.mulf %257, %263 : vector<8x32xf32>
    %265 = vector.extract_strided_slice %167 {offsets = [40, 0], sizes = [8, 128], strides = [1, 1]} : vector<64x128xf32> to vector<8x128xf32>
    %cst_44 = arith.constant dense<0.000000e+00> : vector<8x128xf32>
    %266 = tpu.matmul %264, %163, %cst_44 {dimension_numbers = #tpu.dot_dimension_numbers<[1], [0], [0], [1], [0, 0, 1, 1], [], []>} : vector<8x32xf32>, vector<32x128xf32>, vector<8x128xf32> -> vector<8x128xf32>
    %267 = arith.addf %265, %266 : vector<8x128xf32>
    %268 = vector.extract_strided_slice %267 {offsets = [0, 0], sizes = [8, 96], strides = [1, 1]} : vector<8x128xf32> to vector<8x96xf32>
    %269 = arith.negf %268 : vector<8x96xf32>
    %270 = math.exp %269 : vector<8x96xf32>
    %cst_45 = arith.constant 1.000000e+00 : f32
    %271 = vector.broadcast %cst_45 : f32 to vector<8x96xf32>
    %272 = arith.addf %271, %270 : vector<8x96xf32>
    %273 = arith.divf %271, %272 : vector<8x96xf32>
    %274 = vector.extract_strided_slice %273 {offsets = [0, 0], sizes = [8, 32], strides = [1, 1]} : vector<8x96xf32> to vector<8x32xf32>
    %275 = vector.extract_strided_slice %273 {offsets = [0, 32], sizes = [8, 32], strides = [1, 1]} : vector<8x96xf32> to vector<8x32xf32>
    %276 = vector.extract_strided_slice %273 {offsets = [0, 64], sizes = [8, 32], strides = [1, 1]} : vector<8x96xf32> to vector<8x32xf32>
    %277 = vector.extract_strided_slice %267 {offsets = [0, 96], sizes = [8, 32], strides = [1, 1]} : vector<8x128xf32> to vector<8x32xf32>
    %278 = math.tanh %277 : vector<8x32xf32>
    %279 = arith.mulf %275, %262 : vector<8x32xf32>
    %280 = arith.mulf %274, %278 : vector<8x32xf32>
    %281 = arith.addf %279, %280 : vector<8x32xf32>
    %282 = math.tanh %281 : vector<8x32xf32>
    %283 = arith.mulf %276, %282 : vector<8x32xf32>
    %284 = vector.extract_strided_slice %167 {offsets = [48, 0], sizes = [8, 128], strides = [1, 1]} : vector<64x128xf32> to vector<8x128xf32>
    %cst_46 = arith.constant dense<0.000000e+00> : vector<8x128xf32>
    %285 = tpu.matmul %283, %163, %cst_46 {dimension_numbers = #tpu.dot_dimension_numbers<[1], [0], [0], [1], [0, 0, 1, 1], [], []>} : vector<8x32xf32>, vector<32x128xf32>, vector<8x128xf32> -> vector<8x128xf32>
    %286 = arith.addf %284, %285 : vector<8x128xf32>
    %287 = vector.extract_strided_slice %286 {offsets = [0, 0], sizes = [8, 96], strides = [1, 1]} : vector<8x128xf32> to vector<8x96xf32>
    %288 = arith.negf %287 : vector<8x96xf32>
    %289 = math.exp %288 : vector<8x96xf32>
    %cst_47 = arith.constant 1.000000e+00 : f32
    %290 = vector.broadcast %cst_47 : f32 to vector<8x96xf32>
    %291 = arith.addf %290, %289 : vector<8x96xf32>
    %292 = arith.divf %290, %291 : vector<8x96xf32>
    %293 = vector.extract_strided_slice %292 {offsets = [0, 0], sizes = [8, 32], strides = [1, 1]} : vector<8x96xf32> to vector<8x32xf32>
    %294 = vector.extract_strided_slice %292 {offsets = [0, 32], sizes = [8, 32], strides = [1, 1]} : vector<8x96xf32> to vector<8x32xf32>
    %295 = vector.extract_strided_slice %292 {offsets = [0, 64], sizes = [8, 32], strides = [1, 1]} : vector<8x96xf32> to vector<8x32xf32>
    %296 = vector.extract_strided_slice %286 {offsets = [0, 96], sizes = [8, 32], strides = [1, 1]} : vector<8x128xf32> to vector<8x32xf32>
    %297 = math.tanh %296 : vector<8x32xf32>
    %298 = arith.mulf %294, %281 : vector<8x32xf32>
    %299 = arith.mulf %293, %297 : vector<8x32xf32>
    %300 = arith.addf %298, %299 : vector<8x32xf32>
    %301 = math.tanh %300 : vector<8x32xf32>
    %302 = arith.mulf %295, %301 : vector<8x32xf32>
    %303 = vector.extract_strided_slice %167 {offsets = [56, 0], sizes = [8, 128], strides = [1, 1]} : vector<64x128xf32> to vector<8x128xf32>
    %cst_48 = arith.constant dense<0.000000e+00> : vector<8x128xf32>
    %304 = tpu.matmul %302, %163, %cst_48 {dimension_numbers = #tpu.dot_dimension_numbers<[1], [0], [0], [1], [0, 0, 1, 1], [], []>} : vector<8x32xf32>, vector<32x128xf32>, vector<8x128xf32> -> vector<8x128xf32>
    %305 = arith.addf %303, %304 : vector<8x128xf32>
    %306 = vector.extract_strided_slice %305 {offsets = [0, 0], sizes = [8, 96], strides = [1, 1]} : vector<8x128xf32> to vector<8x96xf32>
    %307 = arith.negf %306 : vector<8x96xf32>
    %308 = math.exp %307 : vector<8x96xf32>
    %cst_49 = arith.constant 1.000000e+00 : f32
    %309 = vector.broadcast %cst_49 : f32 to vector<8x96xf32>
    %310 = arith.addf %309, %308 : vector<8x96xf32>
    %311 = arith.divf %309, %310 : vector<8x96xf32>
    %312 = vector.extract_strided_slice %311 {offsets = [0, 0], sizes = [8, 32], strides = [1, 1]} : vector<8x96xf32> to vector<8x32xf32>
    %313 = vector.extract_strided_slice %311 {offsets = [0, 32], sizes = [8, 32], strides = [1, 1]} : vector<8x96xf32> to vector<8x32xf32>
    %314 = vector.extract_strided_slice %311 {offsets = [0, 64], sizes = [8, 32], strides = [1, 1]} : vector<8x96xf32> to vector<8x32xf32>
    %315 = vector.extract_strided_slice %305 {offsets = [0, 96], sizes = [8, 32], strides = [1, 1]} : vector<8x128xf32> to vector<8x32xf32>
    %316 = math.tanh %315 : vector<8x32xf32>
    %317 = arith.mulf %313, %300 : vector<8x32xf32>
    %318 = arith.mulf %312, %316 : vector<8x32xf32>
    %319 = arith.addf %317, %318 : vector<8x32xf32>
    %320 = math.tanh %319 : vector<8x32xf32>
    %321 = arith.mulf %314, %320 : vector<8x32xf32>
    %c0_50 = arith.constant 0 : index
    %c0_51 = arith.constant 0 : index
    %322 = vector.load %arg7[%c0_50, %c0_51] : memref<32x128xf32, #tpu.memory_space<vmem>>, vector<32x128xf32>
    %cst_52 = arith.constant dense<0.000000e+00> : vector<8x128xf32>
    %323 = tpu.matmul %321, %322, %cst_52 {dimension_numbers = #tpu.dot_dimension_numbers<[1], [0], [0], [1], [0, 0, 1, 1], [], []>} : vector<8x32xf32>, vector<32x128xf32>, vector<8x128xf32> -> vector<8x128xf32>
    %c0_53 = arith.constant 0 : index
    %c0_54 = arith.constant 0 : index
    %324 = vector.load %arg8[%c0_53, %c0_54] : memref<1x128xf32, #tpu.memory_space<vmem>>, vector<1x128xf32>
    %325 = vector.broadcast %324 : vector<1x128xf32> to vector<8x128xf32>
    %326 = arith.addf %323, %325 : vector<8x128xf32>
    %c0_55 = arith.constant 0 : index
    %c0_56 = arith.constant 0 : index
    %327 = vector.load %arg9[%c0_55, %c0_56] : memref<8x128xf32, #tpu.memory_space<vmem>>, vector<8x128xf32>
    tpu.vector_store %arg9[%c0_55, %c0_56], %326 {strides = array<i32>} : memref<8x128xf32, #tpu.memory_space<vmem>>, vector<8x128xf32>,
    return
  }
}

</mosaic_0001>

<bundles_post_ra>
// kernel: lstm_model_forward.1
= control target key start
LH: loop header
LB: loop body
LE: loop exit
PB: predicated region body
PF: predicated region fallthrough
CT: control target
= control target key end

     0   :  { %v2505_v0 = vmov 0.0   ;;  %vm2506_vm0 = vmmov 0   ;;  %vm53_vm1 = vcmask 130048   ;;  %s2507_s25 = smov 32   ;;  %vm183_vm2 = vcmask 261120   ;;  %s2995_s1 = inlined_call_operand.vmem [shape: f32[16,128], index: 1, kind: input, shape index: {}]   ;;  %s2996_s2 = inlined_call_operand.vmem [shape: f32[32,128], index: 2, kind: input, shape index: {}]   ;;  %s2997_s0 = inlined_call_operand.vmem [shape: f32[64,16], index: 0, kind: input, shape index: {}]   ;;  %s2998_s3 = inlined_call_operand.vmem [shape: f32[1,128], index: 3, kind: input, shape index: {}]   ;;  %s2999_s4 = inlined_call_operand.vmem [shape: f32[32,128], index: 4, kind: input, shape index: {}]   ;;  %s3000_s5 = inlined_call_operand.vmem [shape: f32[32,128], index: 5, kind: input, shape index: {}]   ;;  %s3001_s6 = inlined_call_operand.vmem [shape: f32[1,128], index: 6, kind: input, shape index: {}]   ;;  %s3002_s7 = inlined_call_operand.vmem [shape: f32[32,128], index: 7, kind: input, shape index: {}]   ;;  %s3003_s8 = inlined_call_operand.vmem [shape: f32[1,128], index: 8, kind: input, shape index: {}]   ;;  %s3004_s9 = inlined_call_operand.vmem [shape: f32[8,128], index: 9, kind: output, shape index: {}]  }
   0x1   :  { %2166 = vmatprep.subr.mxu1 %v2505_v0  ;;  %v41_v1 = vld [vmem:[%s2995_s1 + $0x8] sm:$0xff]  ;;  %v2566_v2 = vld [vmem:[%s2996_s2 + $0x18] sm:$0xff]  ;;  %v40_v3 = vld [vmem:[%s2995_s1] sm:$0xff]  ;;  %2174 = vmatprep.mubr.msk.f32.mxu1 %vm2506_vm0, %v2505_v0 }
   0x2   :  { %2150 = vmatprep.subr.mxu0 %v41_v1  ;;  %2167 = vmatpush3.msra.mxu1 %v2566_v2  ;;  %v2577_v4 = vld [vmem:[%s2996_s2 + $0x10] sm:$0xff]  ;;  %v32_v5 = vld [vmem:[%s2997_s0] sm:$0xff]  ;;  %v33_v6 = vld [vmem:[%s2997_s0 + $0x8] sm:$0xff] }
   0x3   :  { %2151 = vmatpush3.msra.mxu0 %v41_v1  ;;  %2168 = vmatprep.subr.mxu1 %v2505_v0  ;;  %v2590_v7 = vld [vmem:[%s2996_s2 + $0x8] sm:$0xff]  ;;  %v2598_v8 = vld [vmem:[%s2996_s2] sm:$0xff]  ;;  %v34_v44 = vld [vmem:[%s2997_s0 + $0x10] sm:$0xff] }
   0x4   :  { %2152 = vmatprep.subr.mxu0 %v40_v3  ;;  %2169 = vmatpush3.msra.mxu1 %v2577_v4  ;;  %v2627_v10 = vld [vmem:[%s2998_s3] ss:$0 sm:$0xff]  ;;  %s2508_s3 = smov 64   ;;  %v35_v45 = vld [vmem:[%s2997_s0 + $0x18] sm:$0xff]  ;;  %v37_v47 = vld [vmem:[%s2997_s0 + $0x28] sm:$0xff] }
   0x5   :  { %2153 = vmatpush3.msra.mxu0 %v40_v3  ;;  %2154 = vmatprep.mubr.msk.f32.mxu0 %vm53_vm1, %v32_v5  ;;  %v36_v46 = vld [vmem:[%s2997_s0 + $0x20] sm:$0xff]  ;;  %v38_v48 = vld [vmem:[%s2997_s0 + $0x30] sm:$0xff]  ;;  %v39_v49 = vld [vmem:[%s2997_s0 + $0x38] sm:$0xff] }
   0x6   :  { %2170 = vmatprep.subr.mxu1 %v2505_v0  ;;  %2155 = vmatmul.mubr.msk.f32.vlgmr.msra.gmra.mxu0 %vm53_vm1, %v33_v6 }
   0x7   :  { %2171 = vmatpush3.msra.mxu1 %v2590_v7  ;;  %2188 = vmatprep.subr.mxu0 %v2505_v0 }
   0x8   :  { %2172 = vmatprep.subr.mxu1 %v2505_v0  ;;  %2189 = vmatpush3.msra.mxu0 %v2566_v2 }
   0x9   :  { %2173 = vmatpush3.msra.mxu1 %v2598_v8  ;;  %2190 = vmatprep.subr.mxu0 %v2505_v0 }
   0xa   :  { %2175 = vmatmul.mubr.f32.vlgmr.msra.gmra.mxu1 %v2505_v0  ;;  %2177 = vmatprep.subr.mxu1 %v2505_v0 }
   0xb   :  { %2178 = vmatpush3.msra.mxu1 %v2566_v2  ;;  %2185 = vmatprep.mubr.msk.f32.mxu1 %vm2506_vm0, %v2505_v0 }
   0xc   :  { %2179 = vmatprep.subr.mxu1 %v2505_v0  ;;  %2191 = vmatpush3.msra.mxu0 %v2577_v4 }
   0xd   :  { %2180 = vmatpush3.msra.mxu1 %v2577_v4  ;;  %2192 = vmatprep.subr.mxu0 %v2505_v0 }
   0xe   :  { %2181 = vmatprep.subr.mxu1 %v2505_v0  ;;  %2193 = vmatpush3.msra.mxu0 %v2590_v7 }
   0xf   :  { %2182 = vmatpush3.msra.mxu1 %v2590_v7  ;;  %2194 = vmatprep.subr.mxu0 %v2505_v0 }
  0x10   :  { %2183 = vmatprep.subr.mxu1 %v2505_v0  ;;  %2195 = vmatpush3.msra.mxu0 %v2598_v8 }
  0x11   :  { %2184 = vmatpush3.msra.mxu1 %v2598_v8  ;;  %2210 = vmatprep.subr.mxu0 %v2505_v0 }
  0x12   :  { %2199 = vmatprep.subr.mxu1 %v2505_v0  ;;  %2157 = vmatprep.mubr.msk.f32.mxu0 %vm53_vm1, %v34_v44 }
  0x13   :  { %2158 = vmatmul.mubr.msk.f32.gmra.mxu0 %vm53_vm1, %v35_v45 }
  0x14   :  { %2160 = vmatprep.mubr.msk.f32.mxu0 %vm53_vm1, %v36_v46 }
  0x17   :  { %2161 = vmatmul.mubr.msk.f32.gmra.mxu0 %vm53_vm1, %v37_v47 }
  0x18   :  { %2163 = vmatprep.mubr.msk.f32.mxu0 %vm53_vm1, %v38_v48 }
  0x1b   :  { %2164 = vmatmul.mubr.msk.f32.gmra.mxu0 %vm53_vm1, %v39_v49 }
  0x1c   :  { %2196 = vmatprep.mubr.msk.f32.mxu0 %vm2506_vm0, %v2505_v0 }
  0xc6   :  { %v2156_v9 = vpop.f32.mrf.mxu0 }
  0xc7   :  { %v150_v30 = vadd.f32 %v2156_v9, %v2627_v10 }
  0xc8   :  { %v144_v11 = vpop.f32.mrf.mxu0 }
  0xc9   :  { %v145_v12 = vadd.f32 %v2627_v10, %v144_v11 }
  0xca   :  { %v253_v13 = vpop.f32.mrf.mxu1 }
  0xcb   :  { %v257_v14 = vadd.f32 %v253_v13, %v145_v12 }
  0xcc   :  { %v2176_v15 = vpop.f32.mrf.mxu1 }
  0xcd   :  { %2377 = vtanh.f32 %v257_v14  ;;  %v2002_v17 = vmul.f32 -1.442695, %v257_v14 }
  0xcf   :  { %2379 = vpow2.f32 %v2002_v17 }
  0xd3   :  { %v2159_v54 = vpop.f32.mrf.mxu0 }
  0xd5   :  { %v154_v55 = vpop.f32.mrf.mxu0 }
  0xd6   :  { %v155_v60 = vadd.f32 %v2627_v10, %v154_v55 }
  0xd7   :  { %v2693_v56 = vpop.f32.mrf.mxu0 }
  0xd9   :  { %v2695_v57 = vpop.f32.mrf.mxu0 }
  0xda   :  { %v2378_v16 = vpop.eup %2377 }
  0xdb   :  { %267 = vrot.lane.b32.xlu0 %v2378_v16, %s2507_s25  ;;  %v2697_v58 = vpop.f32.mrf.mxu0 }
  0xdc   :  { %v2380_v18 = vpop.eup %2379 }
  0xdd   :  { %v261_v19 = vadd.f32 1.0, %v2380_v18  ;;  %v2699_v59 = vpop.f32.mrf.mxu0 }
  0xdf   :  { %2381 = vrcp.f32 %v261_v19 }
  0xec   :  { %v2382_v20 = vpop.eup %2381 }
  0xed   :  { %v265_v23 = vmul.f32 0.0, %v2382_v20 }
 0x14d   :  { %v268_v21 = vpop.permute.xlu0 %267 }
 0x14e   :  { %v270_v22 = vmul.f32 %v2382_v20, %v268_v21 }
 0x150   :  { %272 = vrot.lane.b32.xlu0 %v270_v22, %s2507_s25 }
 0x1c2   :  { %v273_v24 = vpop.permute.xlu0 %272 }
 0x1c3   :  { %v275_v25 = vadd.f32 %v273_v24, %v265_v23 }
 0x1c5   :  { %2383 = vtanh.f32 %v275_v25 }
 0x1d2   :  { %v2384_v26 = vpop.eup %2383 }
 0x1d3   :  { %278 = vrot.lane.b32.xlu1 %v2384_v26, %s2507_s25 }
 0x245   :  { %v279_v27 = vpop.permute.xlu1 %278 }
 0x246   :  { %v281_v28 = vmul.f32 %v2382_v20, %v279_v27  ;;  %v160_v20 = vadd.f32 %v2159_v54, %v2627_v10 }
 0x248   :  { %283 = vrot.lane.b32.xlu1 %v281_v28, %s2508_s3 }
 0x2ba   :  { %v2634_v29 = vpop.permute.xlu1 %283 }
 0x2bb   :  { %2186 = vmatmul.mubr.msk.f32.vlgmr.msra.gmra.mxu1 %vm183_vm2, %v2634_v29 }
 0x2bc   :  { %2200 = vmatpush3.msra.mxu1 %v2566_v2  ;;  %2207 = vmatprep.mubr.msk.f32.mxu1 %vm2506_vm0, %v2505_v0 }
 0x2bd   :  { %2201 = vmatprep.subr.mxu1 %v2505_v0 }
 0x2be   :  { %2202 = vmatpush3.msra.mxu1 %v2577_v4 }
 0x2bf   :  { %2203 = vmatprep.subr.mxu1 %v2505_v0 }
 0x2c0   :  { %2204 = vmatpush3.msra.mxu1 %v2590_v7 }
 0x2c1   :  { %2205 = vmatprep.subr.mxu1 %v2505_v0 }
 0x2c2   :  { %2206 = vmatpush3.msra.mxu1 %v2598_v8 }
 0x2c3   :  { %2221 = vmatprep.subr.mxu1 %v2505_v0 }
 0x37b   :  { %v353_v31 = vpop.f32.mrf.mxu1 }
 0x37c   :  { %v357_v32 = vadd.f32 %v353_v31, %v150_v30 }
 0x37d   :  { %v2187_v33 = vpop.f32.mrf.mxu1 }
 0x37e   :  { %2385 = vtanh.f32 %v357_v32  ;;  %v2004_v35 = vmul.f32 -1.442695, %v357_v32 }
 0x380   :  { %2387 = vpow2.f32 %v2004_v35 }
 0x38b   :  { %v2386_v34 = vpop.eup %2385 }
 0x38c   :  { %367 = vrot.lane.b32.xlu0 %v2386_v34, %s2507_s25 }
 0x38d   :  { %v2388_v36 = vpop.eup %2387 }
 0x38e   :  { %v361_v37 = vadd.f32 1.0, %v2388_v36 }
 0x390   :  { %2389 = vrcp.f32 %v361_v37 }
 0x39d   :  { %v2390_v38 = vpop.eup %2389 }
 0x39e   :  { %v365_v41 = vmul.f32 %v2390_v38, %v275_v25 }
 0x3fe   :  { %v368_v39 = vpop.permute.xlu0 %367 }
 0x3ff   :  { %v370_v40 = vmul.f32 %v2390_v38, %v368_v39  ;;  %v165_v39 = vadd.f32 %v2627_v10, %v2695_v57 }
 0x401   :  { %372 = vrot.lane.b32.xlu1 %v370_v40, %s2507_s25 }
 0x473   :  { %v373_v42 = vpop.permute.xlu1 %372 }
 0x474   :  { %v375_v43 = vadd.f32 %v373_v42, %v365_v41 }
 0x476   :  { %2391 = vtanh.f32 %v375_v43 }
 0x483   :  { %v2392_v50 = vpop.eup %2391 }
 0x484   :  { %378 = vrot.lane.b32.xlu0 %v2392_v50, %s2507_s25 }
 0x4f6   :  { %v379_v51 = vpop.permute.xlu0 %378 }
 0x4f7   :  { %v381_v52 = vmul.f32 %v2390_v38, %v379_v51 }
 0x4f9   :  { %383 = vrot.lane.b32.xlu1 %v381_v52, %s2508_s3 }
 0x56b   :  { %v2679_v53 = vpop.permute.xlu1 %383 }
 0x56c   :  { %2197 = vmatmul.mubr.msk.f32.vlgmr.msra.gmra.mxu0 %vm183_vm2, %v2679_v53 }
 0x56d   :  { %2211 = vmatpush3.msra.mxu0 %v2566_v2  ;;  %2218 = vmatprep.mubr.msk.f32.mxu0 %vm2506_vm0, %v2505_v0 }
 0x56e   :  { %2212 = vmatprep.subr.mxu0 %v2505_v0 }
 0x56f   :  { %2213 = vmatpush3.msra.mxu0 %v2577_v4 }
 0x570   :  { %2214 = vmatprep.subr.mxu0 %v2505_v0 }
 0x571   :  { %2215 = vmatpush3.msra.mxu0 %v2590_v7 }
 0x572   :  { %2216 = vmatprep.subr.mxu0 %v2505_v0 }
 0x573   :  { %2217 = vmatpush3.msra.mxu0 %v2598_v8 }
 0x574   :  { %2232 = vmatprep.subr.mxu0 %v2505_v0 }
 0x62c   :  { %v453_v61 = vpop.f32.mrf.mxu0 }
 0x62d   :  { %v457_v62 = vadd.f32 %v453_v61, %v155_v60 }
 0x62e   :  { %v2198_v63 = vpop.f32.mrf.mxu0 }
 0x62f   :  { %2393 = vtanh.f32 %v457_v62  ;;  %v2006_v3 = vmul.f32 -1.442695, %v457_v62 }
 0x631   :  { %2395 = vpow2.f32 %v2006_v3 }
 0x63c   :  { %v2394_v1 = vpop.eup %2393 }
 0x63d   :  { %467 = vrot.lane.b32.xlu0 %v2394_v1, %s2507_s25 }
 0x63e   :  { %v2396_v5 = vpop.eup %2395 }
 0x63f   :  { %v461_v6 = vadd.f32 1.0, %v2396_v5 }
 0x641   :  { %2397 = vrcp.f32 %v461_v6 }
 0x64e   :  { %v2398_v9 = vpop.eup %2397 }
 0x64f   :  { %v465_v13 = vmul.f32 %v2398_v9, %v375_v43 }
 0x6af   :  { %v468_v11 = vpop.permute.xlu0 %467 }
 0x6b0   :  { %v470_v12 = vmul.f32 %v2398_v9, %v468_v11 }
 0x6b2   :  { %472 = vrot.lane.b32.xlu1 %v470_v12, %s2507_s25  ;;  %v985_v12 = vld [vmem:[%s2999_s4 + $0x18] sm:$0xff] }
 0x724   :  { %v473_v14 = vpop.permute.xlu1 %472 }
 0x725   :  { %v475_v15 = vadd.f32 %v473_v14, %v465_v13 }
 0x727   :  { %2399 = vtanh.f32 %v475_v15 }
 0x734   :  { %v2400_v16 = vpop.eup %2399 }
 0x735   :  { %478 = vrot.lane.b32.xlu0 %v2400_v16, %s2507_s25 }
 0x7a7   :  { %v479_v17 = vpop.permute.xlu0 %478 }
 0x7a8   :  { %v481_v18 = vmul.f32 %v2398_v9, %v479_v17  ;;  %v984_v17 = vld [vmem:[%s2999_s4 + $0x10] sm:$0xff] }
 0x7aa   :  { %483 = vrot.lane.b32.xlu1 %v481_v18, %s2508_s3  ;;  %v983_v18 = vld [vmem:[%s2999_s4 + $0x8] sm:$0xff] }
 0x81c   :  { %v2706_v19 = vpop.permute.xlu1 %483 }
 0x81d   :  { %2208 = vmatmul.mubr.msk.f32.vlgmr.msra.gmra.mxu1 %vm183_vm2, %v2706_v19 }
 0x81e   :  { %2222 = vmatpush3.msra.mxu1 %v2566_v2  ;;  %2229 = vmatprep.mubr.msk.f32.mxu1 %vm2506_vm0, %v2505_v0 }
 0x81f   :  { %2223 = vmatprep.subr.mxu1 %v2505_v0 }
 0x820   :  { %2224 = vmatpush3.msra.mxu1 %v2577_v4 }
 0x821   :  { %2225 = vmatprep.subr.mxu1 %v2505_v0 }
 0x822   :  { %2226 = vmatpush3.msra.mxu1 %v2590_v7 }
 0x823   :  { %2227 = vmatprep.subr.mxu1 %v2505_v0 }
 0x824   :  { %2228 = vmatpush3.msra.mxu1 %v2598_v8 }
 0x825   :  { %2243 = vmatprep.subr.mxu1 %v2505_v0 }
 0x8dd   :  { %v553_v21 = vpop.f32.mrf.mxu1 }
 0x8de   :  { %v557_v22 = vadd.f32 %v553_v21, %v160_v20  ;;  %v982_v20 = vld [vmem:[%s2999_s4] sm:$0xff] }
 0x8df   :  { %v2209_v23 = vpop.f32.mrf.mxu1 }
 0x8e0   :  { %2401 = vtanh.f32 %v557_v22  ;;  %v2008_v25 = vmul.f32 -1.442695, %v557_v22 }
 0x8e2   :  { %2403 = vpow2.f32 %v2008_v25 }
 0x8ed   :  { %v2402_v24 = vpop.eup %2401 }
 0x8ee   :  { %567 = vrot.lane.b32.xlu0 %v2402_v24, %s2507_s25 }
 0x8ef   :  { %v2404_v26 = vpop.eup %2403 }
 0x8f0   :  { %v561_v27 = vadd.f32 1.0, %v2404_v26 }
 0x8f2   :  { %2405 = vrcp.f32 %v561_v27 }
 0x8ff   :  { %v2406_v28 = vpop.eup %2405 }
 0x900   :  { %v565_v32 = vmul.f32 %v2406_v28, %v475_v15 }
 0x960   :  { %v568_v30 = vpop.permute.xlu0 %567 }
 0x961   :  { %v570_v31 = vmul.f32 %v2406_v28, %v568_v30 }
 0x963   :  { %572 = vrot.lane.b32.xlu1 %v570_v31, %s2507_s25 }
 0x9d5   :  { %v573_v33 = vpop.permute.xlu1 %572 }
 0x9d6   :  { %v575_v34 = vadd.f32 %v573_v33, %v565_v32  ;;  %v2796_v33 = vld [vmem:[%s3000_s5 + $0x18] sm:$0xff] }
 0x9d8   :  { %2407 = vtanh.f32 %v575_v34 }
 0x9e5   :  { %v2408_v35 = vpop.eup %2407 }
 0x9e6   :  { %578 = vrot.lane.b32.xlu0 %v2408_v35, %s2507_s25  ;;  %v2809_v35 = vld [vmem:[%s3000_s5 + $0x8] sm:$0xff] }
 0xa58   :  { %v579_v36 = vpop.permute.xlu0 %578 }
 0xa59   :  { %v581_v37 = vmul.f32 %v2406_v28, %v579_v36  ;;  %v2816_v36 = vld [vmem:[%s3000_s5] sm:$0xff] }
 0xa5b   :  { %583 = vrot.lane.b32.xlu1 %v581_v37, %s2508_s3 }
 0xacd   :  { %v2725_v38 = vpop.permute.xlu1 %583 }
 0xace   :  { %2219 = vmatmul.mubr.msk.f32.vlgmr.msra.gmra.mxu0 %vm183_vm2, %v2725_v38 }
 0xacf   :  { %2233 = vmatpush3.msra.mxu0 %v2566_v2  ;;  %2240 = vmatprep.mubr.msk.f32.mxu0 %vm2506_vm0, %v2505_v0 }
 0xad0   :  { %2234 = vmatprep.subr.mxu0 %v2505_v0 }
 0xad1   :  { %2235 = vmatpush3.msra.mxu0 %v2577_v4 }
 0xad2   :  { %2236 = vmatprep.subr.mxu0 %v2505_v0 }
 0xad3   :  { %2237 = vmatpush3.msra.mxu0 %v2590_v7 }
 0xad4   :  { %2238 = vmatprep.subr.mxu0 %v2505_v0 }
 0xad5   :  { %2239 = vmatpush3.msra.mxu0 %v2598_v8 }
 0xad6   :  { %2254 = vmatprep.subr.mxu0 %v985_v12 }
 0xb8e   :  { %v653_v40 = vpop.f32.mrf.mxu0 }
 0xb8f   :  { %v657_v41 = vadd.f32 %v653_v40, %v165_v39  ;;  %v180_v40 = vadd.f32 %v2697_v58, %v2627_v10 }
 0xb90   :  { %v2220_v42 = vpop.f32.mrf.mxu0 }
 0xb91   :  { %2409 = vtanh.f32 %v657_v41  ;;  %v2010_v44 = vmul.f32 -1.442695, %v657_v41 }
 0xb93   :  { %2411 = vpow2.f32 %v2010_v44 }
 0xb9e   :  { %v2410_v43 = vpop.eup %2409 }
 0xb9f   :  { %667 = vrot.lane.b32.xlu0 %v2410_v43, %s2507_s25 }
 0xba0   :  { %v2412_v45 = vpop.eup %2411 }
 0xba1   :  { %v661_v46 = vadd.f32 1.0, %v2412_v45 }
 0xba3   :  { %2413 = vrcp.f32 %v661_v46  ;;  %v2852_v46 = vld [vmem:[%s3001_s6] ss:$0 sm:$0xff] }
 0xbb0   :  { %v2414_v47 = vpop.eup %2413 }
 0xbb1   :  { %v665_v50 = vmul.f32 %v2414_v47, %v575_v34  ;;  %v2802_v34 = vld [vmem:[%s3000_s5 + $0x10] sm:$0xff] }
 0xc11   :  { %v668_v48 = vpop.permute.xlu0 %667 }
 0xc12   :  { %v670_v49 = vmul.f32 %v2414_v47, %v668_v48 }
 0xc14   :  { %672 = vrot.lane.b32.xlu1 %v670_v49, %s2507_s25 }
 0xc86   :  { %v673_v51 = vpop.permute.xlu1 %672 }
 0xc87   :  { %v675_v52 = vadd.f32 %v673_v51, %v665_v50 }
 0xc89   :  { %2415 = vtanh.f32 %v675_v52 }
 0xc96   :  { %v2416_v54 = vpop.eup %2415 }
 0xc97   :  { %678 = vrot.lane.b32.xlu0 %v2416_v54, %s2507_s25 }
 0xd09   :  { %v679_v55 = vpop.permute.xlu0 %678 }
 0xd0a   :  { %v681_v57 = vmul.f32 %v2414_v47, %v679_v55 }
 0xd0c   :  { %683 = vrot.lane.b32.xlu1 %v681_v57, %s2508_s3 }
 0xd7e   :  { %v684_v60 = vpop.permute.xlu1 %683 }
 0xd7f   :  { %2230 = vmatmul.mubr.msk.f32.vlgmr.msra.gmra.mxu1 %vm183_vm2, %v684_v60 }
 0xd80   :  { %2244 = vmatpush3.msra.mxu1 %v2566_v2  ;;  %2251 = vmatprep.mubr.msk.f32.mxu1 %vm2506_vm0, %v2505_v0  ;;  %v170_v2 = vadd.f32 %v2693_v56, %v2627_v10 }
 0xd81   :  { %2245 = vmatprep.subr.mxu1 %v2505_v0 }
 0xd82   :  { %2246 = vmatpush3.msra.mxu1 %v2577_v4 }
 0xd83   :  { %2247 = vmatprep.subr.mxu1 %v2505_v0 }
 0xd84   :  { %2248 = vmatpush3.msra.mxu1 %v2590_v7 }
 0xd85   :  { %2249 = vmatprep.subr.mxu1 %v2505_v0 }
 0xd86   :  { %2250 = vmatpush3.msra.mxu1 %v2598_v8 }
 0xd87   :  { %2274 = vmatprep.subr.mxu1 %v2505_v0 }
 0xe3f   :  { %v753_v61 = vpop.f32.mrf.mxu1 }
 0xe40   :  { %v757_v62 = vadd.f32 %v753_v61, %v170_v2 }
 0xe41   :  { %v2231_v63 = vpop.f32.mrf.mxu1 }
 0xe42   :  { %2417 = vtanh.f32 %v757_v62  ;;  %v2012_v4 = vmul.f32 -1.442695, %v757_v62 }
 0xe44   :  { %2419 = vpow2.f32 %v2012_v4 }
 0xe4f   :  { %v2418_v1 = vpop.eup %2417 }
 0xe50   :  { %767 = vrot.lane.b32.xlu0 %v2418_v1, %s2507_s25 }
 0xe51   :  { %v2420_v3 = vpop.eup %2419 }
 0xe52   :  { %v761_v7 = vadd.f32 1.0, %v2420_v3 }
 0xe54   :  { %2421 = vrcp.f32 %v761_v7 }
 0xe61   :  { %v2422_v5 = vpop.eup %2421 }
 0xe62   :  { %v765_v9 = vmul.f32 %v2422_v5, %v675_v52 }
 0xec2   :  { %v768_v6 = vpop.permute.xlu0 %767 }
 0xec3   :  { %v770_v8 = vmul.f32 %v2422_v5, %v768_v6 }
 0xec5   :  { %772 = vrot.lane.b32.xlu1 %v770_v8, %s2507_s25 }
 0xf37   :  { %v773_v11 = vpop.permute.xlu1 %772 }
 0xf38   :  { %v775_v56 = vadd.f32 %v773_v11, %v765_v9 }
 0xf3a   :  { %2423 = vtanh.f32 %v775_v56 }
 0xf47   :  { %v2424_v13 = vpop.eup %2423 }
 0xf48   :  { %778 = vrot.lane.b32.xlu0 %v2424_v13, %s2507_s25 }
 0xfba   :  { %v779_v14 = vpop.permute.xlu0 %778 }
 0xfbb   :  { %v781_v15 = vmul.f32 %v2422_v5, %v779_v14 }
 0xfbd   :  { %783 = vrot.lane.b32.xlu1 %v781_v15, %s2508_s3 }
0x102f   :  { %v784_v16 = vpop.permute.xlu1 %783 }
0x1030   :  { %2241 = vmatmul.mubr.msk.f32.vlgmr.msra.gmra.mxu0 %vm183_vm2, %v784_v16 }
0x1031   :  { %2255 = vmatpush3.msra.mxu0 %v985_v12  ;;  %2262 = vmatprep.mubr.msk.f32.mxu0 %vm183_vm2, %v2634_v29  ;;  %v175_v29 = vadd.f32 %v2627_v10, %v2699_v59 }
0x1032   :  { %2256 = vmatprep.subr.mxu0 %v984_v17 }
0x1033   :  { %2257 = vmatpush3.msra.mxu0 %v984_v17 }
0x1034   :  { %2258 = vmatprep.subr.mxu0 %v983_v18 }
0x1035   :  { %2259 = vmatpush3.msra.mxu0 %v983_v18 }
0x1036   :  { %2260 = vmatprep.subr.mxu0 %v982_v20 }
0x1037   :  { %2261 = vmatpush3.msra.mxu0 %v982_v20 }
0x1038   :  { %2263 = vmatmul.mubr.msk.f32.vlgmr.msra.gmra.mxu0 %vm183_vm2, %v2679_v53  ;;  %2296 = vmatprep.subr.mxu0 %v2505_v0 }
0x1039   :  { %2265 = vmatprep.mubr.msk.f32.mxu0 %vm183_vm2, %v2706_v19  ;;  %2297 = vmatpush3.msra.mxu0 %v2796_v33 }
0x103a   :  { %2298 = vmatprep.subr.mxu0 %v2505_v0 }
0x103b   :  { %2299 = vmatpush3.msra.mxu0 %v2802_v34 }
0x103c   :  { %2266 = vmatmul.mubr.msk.f32.gmra.mxu0 %vm183_vm2, %v2725_v38  ;;  %2300 = vmatprep.subr.mxu0 %v2505_v0 }
0x103d   :  { %2268 = vmatprep.mubr.msk.f32.mxu0 %vm183_vm2, %v684_v60  ;;  %2301 = vmatpush3.msra.mxu0 %v2809_v35 }
0x103e   :  { %2302 = vmatprep.subr.mxu0 %v2505_v0 }
0x103f   :  { %2303 = vmatpush3.msra.mxu0 %v2816_v36 }
0x1040   :  { %2269 = vmatmul.mubr.msk.f32.gmra.mxu0 %vm183_vm2, %v784_v16  ;;  %2318 = vmatprep.subr.mxu0 %v2505_v0 }
0x10f0   :  { %v853_v21 = vpop.f32.mrf.mxu0 }
0x10f1   :  { %v857_v22 = vadd.f32 %v853_v21, %v175_v29 }
0x10f2   :  { %v2242_v23 = vpop.f32.mrf.mxu0 }
0x10f3   :  { %2425 = vtanh.f32 %v857_v22  ;;  %v2014_v24 = vmul.f32 -1.442695, %v857_v22 }
0x10f5   :  { %2427 = vpow2.f32 %v2014_v24 }
0x10f8   :  { %v2847_v41 = vpop.f32.mrf.mxu0 }
0x10f9   :  { %v1074_v17 = vadd.f32 %v2847_v41, %v2852_v46 }
0x10fa   :  { %v1068_v45 = vpop.f32.mrf.mxu0 }
0x10fb   :  { %v1069_v47 = vadd.f32 %v2852_v46, %v1068_v45 }
0x1100   :  { %v2426_v53 = vpop.eup %2425 }
0x1101   :  { %867 = vrot.lane.b32.xlu0 %v2426_v53, %s2507_s25 }
0x1102   :  { %v2428_v19 = vpop.eup %2427 }
0x1103   :  { %v861_v25 = vadd.f32 1.0, %v2428_v19 }
0x1105   :  { %2429 = vrcp.f32 %v861_v25 }
0x1112   :  { %v2430_v26 = vpop.eup %2429 }
0x1113   :  { %v865_v30 = vmul.f32 %v2430_v26, %v775_v56 }
0x1173   :  { %v868_v27 = vpop.permute.xlu0 %867 }
0x1174   :  { %v870_v28 = vmul.f32 %v2430_v26, %v868_v27 }
0x1176   :  { %872 = vrot.lane.b32.xlu1 %v870_v28, %s2507_s25 }
0x11e8   :  { %v873_v31 = vpop.permute.xlu1 %872 }
0x11e9   :  { %v2789_v59 = vadd.f32 %v873_v31, %v865_v30 }
0x11eb   :  { %2431 = vtanh.f32 %v2789_v59 }
0x11f8   :  { %v2432_v32 = vpop.eup %2431 }
0x11f9   :  { %878 = vrot.lane.b32.xlu0 %v2432_v32, %s2507_s25 }
0x126b   :  { %v879_v37 = vpop.permute.xlu0 %878 }
0x126c   :  { %v881_v38 = vmul.f32 %v2430_v26, %v879_v37 }
0x126e   :  { %883 = vrot.lane.b32.xlu1 %v881_v38, %s2508_s3  ;;  %v2267_v38 = vpop.f32.mrf.mxu0 }
0x12e0   :  { %v884_v39 = vpop.permute.xlu1 %883 }
0x12e1   :  { %2252 = vmatmul.mubr.msk.f32.vlgmr.msra.gmra.mxu1 %vm183_vm2, %v884_v39  ;;  %2271 = vmatprep.mubr.msk.f32.mxu0 %vm183_vm2, %v884_v39  ;;  %v1078_v39 = vpop.f32.mrf.mxu0 }
0x12e2   :  { %2275 = vmatpush3.msra.mxu1 %v2796_v33  ;;  %2282 = vmatprep.mubr.msk.f32.mxu1 %vm2506_vm0, %v2505_v0 }
0x12e3   :  { %2276 = vmatprep.subr.mxu1 %v2505_v0 }
0x12e4   :  { %2277 = vmatpush3.msra.mxu1 %v2802_v34 }
0x12e5   :  { %2278 = vmatprep.subr.mxu1 %v2505_v0 }
0x12e6   :  { %2279 = vmatpush3.msra.mxu1 %v2809_v35 }
0x12e7   :  { %2280 = vmatprep.subr.mxu1 %v2505_v0 }
0x12e8   :  { %2281 = vmatpush3.msra.mxu1 %v2816_v36 }
0x12e9   :  { %2283 = vmatmul.mubr.f32.vlgmr.msra.gmra.mxu1 %v2505_v0  ;;  %2285 = vmatprep.subr.mxu1 %v2505_v0 }
0x12ea   :  { %2286 = vmatpush3.msra.mxu1 %v2796_v33  ;;  %2293 = vmatprep.mubr.msk.f32.mxu1 %vm2506_vm0, %v2505_v0 }
0x12eb   :  { %2287 = vmatprep.subr.mxu1 %v2505_v0 }
0x12ec   :  { %2288 = vmatpush3.msra.mxu1 %v2802_v34 }
0x12ed   :  { %2289 = vmatprep.subr.mxu1 %v2505_v0 }
0x12ee   :  { %2290 = vmatpush3.msra.mxu1 %v2809_v35 }
0x12ef   :  { %2291 = vmatprep.subr.mxu1 %v2505_v0 }
0x12f0   :  { %2292 = vmatpush3.msra.mxu1 %v2816_v36 }
0x12f1   :  { %2307 = vmatprep.subr.mxu1 %v2505_v0 }
0x13a1   :  { %v953_v42 = vpop.f32.mrf.mxu1 }
0x13a2   :  { %v957_v43 = vadd.f32 %v953_v42, %v180_v40  ;;  %v2895_v40 = vpop.f32.mrf.mxu0 }
0x13a3   :  { %v2253_v44 = vpop.f32.mrf.mxu1 }
0x13a4   :  { %v2016_v1 = vmul.f32 -1.442695, %v957_v43  ;;  %v2897_v41 = vpop.f32.mrf.mxu0  ;;  %v1079_v44 = vadd.f32 %v2852_v46, %v1078_v39 }
0x13a9   :  { %v1173_v48 = vpop.f32.mrf.mxu1 }
0x13aa   :  { %v1177_v49 = vadd.f32 %v1173_v48, %v1069_v47 }
0x13ab   :  { %v2284_v50 = vpop.f32.mrf.mxu1 }
0x13ac   :  { %2433 = vtanh.f32 %v1177_v49  ;;  %v2026_v10 = vmul.f32 -1.442695, %v1177_v49 }
0x13ae   :  { %2435 = vpow2.f32 %v2026_v10 }
0x13b9   :  { %v2434_v51 = vpop.eup %2433 }
0x13ba   :  { %1187 = vrot.lane.b32.xlu0 %v2434_v51, %s2507_s25 }
0x13bb   :  { %v2436_v58 = vpop.eup %2435 }
0x13bc   :  { %v1181_v52 = vadd.f32 1.0, %v2436_v58 }
0x13be   :  { %2437 = vrcp.f32 %v1181_v52 }
0x13cb   :  { %v2438_v54 = vpop.eup %2437 }
0x13cc   :  { %v1185_v60 = vmul.f32 0.0, %v2438_v54 }
0x142c   :  { %v1188_v55 = vpop.permute.xlu0 %1187 }
0x142d   :  { %v1190_v57 = vmul.f32 %v2438_v54, %v1188_v55 }
0x142f   :  { %1192 = vrot.lane.b32.xlu1 %v1190_v57, %s2507_s25 }
0x14a1   :  { %v1193_v2 = vpop.permute.xlu1 %1192 }
0x14a2   :  { %v1195_v61 = vadd.f32 %v1193_v2, %v1185_v60 }
0x14a4   :  { %2439 = vtanh.f32 %v1195_v61 }
0x14a5   :  { %2441 = vtanh.f32 %v957_v43 }
0x14a6   :  { %2443 = vpow2.f32 %v2016_v1  ;;  %v1084_v1 = vadd.f32 %v2267_v38, %v2852_v46 }
0x14b1   :  { %v2440_v62 = vpop.eup %2439 }
0x14b2   :  { %1198 = vrot.lane.b32.xlu0 %v2440_v62, %s2507_s25  ;;  %v2442_v63 = vpop.eup %2441 }
0x14b3   :  { %v2444_v4 = vpop.eup %2443 }
0x14b4   :  { %v961_v3 = vadd.f32 1.0, %v2444_v4 }
0x14b6   :  { %967 = vrot.lane.b32.xlu0 %v2442_v63, %s2507_s25  ;;  %2445 = vrcp.f32 %v961_v3 }
0x14c3   :  { %v2446_v6 = vpop.eup %2445 }
0x14c4   :  { %v965_v56 = vmul.f32 %v2446_v6, %v2789_v59 }
0x1524   :  { %v1199_v7 = vpop.permute.xlu0 %1198 }
0x1525   :  { %v1201_v5 = vmul.f32 %v2438_v54, %v1199_v7 }
0x1527   :  { %1203 = vrot.lane.b32.xlu1 %v1201_v5, %s2508_s3 }
0x1528   :  { %v968_v8 = vpop.permute.xlu0 %967 }
0x1529   :  { %v970_v9 = vmul.f32 %v2446_v6, %v968_v8 }
0x152b   :  { %972 = vrot.lane.b32.xlu0 %v970_v9, %s2507_s25 }
0x1599   :  { %v1204_v11 = vpop.permute.xlu1 %1203 }
0x159a   :  { %2294 = vmatmul.mubr.msk.f32.vlgmr.msra.gmra.mxu1 %vm183_vm2, %v1204_v11 }
0x159b   :  { %2308 = vmatpush3.msra.mxu1 %v2796_v33  ;;  %2315 = vmatprep.mubr.msk.f32.mxu1 %vm2506_vm0, %v2505_v0 }
0x159c   :  { %2309 = vmatprep.subr.mxu1 %v2505_v0 }
0x159d   :  { %v973_v12 = vpop.permute.xlu0 %972  ;;  %2310 = vmatpush3.msra.mxu1 %v2802_v34 }
0x159e   :  { %v975_v13 = vadd.f32 %v973_v12, %v965_v56  ;;  %2311 = vmatprep.subr.mxu1 %v2505_v0 }
0x159f   :  { %2312 = vmatpush3.msra.mxu1 %v2809_v35 }
0x15a0   :  { %2447 = vtanh.f32 %v975_v13  ;;  %2313 = vmatprep.subr.mxu1 %v2505_v0 }
0x15a1   :  { %2314 = vmatpush3.msra.mxu1 %v2816_v36 }
0x15a2   :  { %2329 = vmatprep.subr.mxu1 %v2505_v0 }
0x15ad   :  { %v2448_v14 = vpop.eup %2447 }
0x15ae   :  { %978 = vrot.lane.b32.xlu0 %v2448_v14, %s2507_s25 }
0x1620   :  { %v979_v15 = vpop.permute.xlu0 %978 }
0x1621   :  { %v981_v16 = vmul.f32 %v2446_v6, %v979_v15 }
0x1623   :  { %998 = vrot.lane.b32.xlu0 %v981_v16, %s2508_s3 }
0x165a   :  { %v1273_v18 = vpop.f32.mrf.mxu1 }
0x165b   :  { %v1277_v20 = vadd.f32 %v1273_v18, %v1074_v17 }
0x165c   :  { %v2295_v29 = vpop.f32.mrf.mxu1 }
0x165d   :  { %2449 = vtanh.f32 %v1277_v20  ;;  %v2028_v23 = vmul.f32 -1.442695, %v1277_v20  ;;  %v1089_v29 = vadd.f32 %v2852_v46, %v2897_v41  ;;  %v1094_v41 = vadd.f32 %v2895_v40, %v2852_v46 }
0x165f   :  { %2451 = vpow2.f32 %v2028_v23 }
0x166a   :  { %v2450_v21 = vpop.eup %2449 }
0x166b   :  { %1287 = vrot.lane.b32.xlu1 %v2450_v21, %s2507_s25 }
0x166c   :  { %v2452_v53 = vpop.eup %2451 }
0x166d   :  { %v1281_v24 = vadd.f32 1.0, %v2452_v53 }
0x166f   :  { %2453 = vrcp.f32 %v1281_v24 }
0x167c   :  { %v2454_v19 = vpop.eup %2453 }
0x167d   :  { %v1285_v27 = vmul.f32 %v2454_v19, %v1195_v61 }
0x1695   :  { %v999_v22 = vpop.permute.xlu0 %998 }
0x1696   :  { %2272 = vmatmul.mubr.msk.f32.gmra.mxu0 %vm183_vm2, %v999_v22 }
0x1697   :  { %2304 = vmatprep.mubr.msk.f32.mxu0 %vm2506_vm0, %v2505_v0 }
0x16dd   :  { %v1288_v25 = vpop.permute.xlu1 %1287 }
0x16de   :  { %v1290_v26 = vmul.f32 %v2454_v19, %v1288_v25 }
0x16e0   :  { %1292 = vrot.lane.b32.xlu1 %v1290_v26, %s2507_s25 }
0x1752   :  { %v1293_v28 = vpop.permute.xlu1 %1292 }
0x1753   :  { %v1295_v30 = vadd.f32 %v1293_v28, %v1285_v27 }
0x1755   :  { %2455 = vtanh.f32 %v1295_v30 }
0x1756   :  { %v2899_v42 = vpop.f32.mrf.mxu0 }
0x1758   :  { %v2901_v43 = vpop.f32.mrf.mxu0 }
0x1762   :  { %v2456_v31 = vpop.eup %2455 }
0x1763   :  { %1298 = vrot.lane.b32.xlu1 %v2456_v31, %s2507_s25 }
0x17d5   :  { %v1299_v59 = vpop.permute.xlu1 %1298 }
0x17d6   :  { %v1301_v32 = vmul.f32 %v2454_v19, %v1299_v59 }
0x17d8   :  { %1303 = vrot.lane.b32.xlu1 %v1301_v32, %s2508_s3 }
0x184a   :  { %v1304_v37 = vpop.permute.xlu1 %1303 }
0x184b   :  { %2305 = vmatmul.mubr.msk.f32.vlgmr.msra.gmra.mxu0 %vm183_vm2, %v1304_v37 }
0x184c   :  { %2319 = vmatpush3.msra.mxu0 %v2796_v33  ;;  %2326 = vmatprep.mubr.msk.f32.mxu0 %vm2506_vm0, %v2505_v0 }
0x184d   :  { %2320 = vmatprep.subr.mxu0 %v2505_v0 }
0x184e   :  { %2321 = vmatpush3.msra.mxu0 %v2802_v34 }
0x184f   :  { %2322 = vmatprep.subr.mxu0 %v2505_v0 }
0x1850   :  { %2323 = vmatpush3.msra.mxu0 %v2809_v35 }
0x1851   :  { %2324 = vmatprep.subr.mxu0 %v2505_v0 }
0x1852   :  { %2325 = vmatpush3.msra.mxu0 %v2816_v36 }
0x1853   :  { %2340 = vmatprep.subr.mxu0 %v2505_v0 }
0x190b   :  { %v1373_v45 = vpop.f32.mrf.mxu0 }
0x190c   :  { %v1377_v47 = vadd.f32 %v1373_v45, %v1079_v44 }
0x190d   :  { %v2306_v48 = vpop.f32.mrf.mxu0 }
0x190e   :  { %2457 = vtanh.f32 %v1377_v47  ;;  %v2030_v50 = vmul.f32 -1.442695, %v1377_v47 }
0x1910   :  { %2459 = vpow2.f32 %v2030_v50 }
0x191b   :  { %v2458_v49 = vpop.eup %2457 }
0x191c   :  { %1387 = vrot.lane.b32.xlu0 %v2458_v49, %s2507_s25 }
0x191d   :  { %v2460_v51 = vpop.eup %2459 }
0x191e   :  { %v1381_v10 = vadd.f32 1.0, %v2460_v51 }
0x1920   :  { %2461 = vrcp.f32 %v1381_v10 }
0x192d   :  { %v2462_v58 = vpop.eup %2461 }
0x192e   :  { %v1385_v55 = vmul.f32 %v2462_v58, %v1295_v30 }
0x198e   :  { %v1388_v52 = vpop.permute.xlu0 %1387 }
0x198f   :  { %v1390_v54 = vmul.f32 %v2462_v58, %v1388_v52 }
0x1991   :  { %1392 = vrot.lane.b32.xlu1 %v1390_v54, %s2507_s25 }
0x1a03   :  { %v1393_v57 = vpop.permute.xlu1 %1392 }
0x1a04   :  { %v1395_v60 = vadd.f32 %v1393_v57, %v1385_v55  ;;  %v1099_v57 = vadd.f32 %v2852_v46, %v2901_v43 }
0x1a06   :  { %2463 = vtanh.f32 %v1395_v60 }
0x1a13   :  { %v2464_v2 = vpop.eup %2463 }
0x1a14   :  { %1398 = vrot.lane.b32.xlu0 %v2464_v2, %s2507_s25 }
0x1a86   :  { %v1399_v61 = vpop.permute.xlu0 %1398 }
0x1a87   :  { %v1401_v62 = vmul.f32 %v2462_v58, %v1399_v61 }
0x1a89   :  { %1403 = vrot.lane.b32.xlu1 %v1401_v62, %s2508_s3 }
0x1afb   :  { %v1404_v63 = vpop.permute.xlu1 %1403 }
0x1afc   :  { %2316 = vmatmul.mubr.msk.f32.vlgmr.msra.gmra.mxu1 %vm183_vm2, %v1404_v63 }
0x1afd   :  { %2330 = vmatpush3.msra.mxu1 %v2796_v33  ;;  %2337 = vmatprep.mubr.msk.f32.mxu1 %vm2506_vm0, %v2505_v0 }
0x1afe   :  { %2331 = vmatprep.subr.mxu1 %v2505_v0 }
0x1aff   :  { %2332 = vmatpush3.msra.mxu1 %v2802_v34 }
0x1b00   :  { %2333 = vmatprep.subr.mxu1 %v2505_v0 }
0x1b01   :  { %2334 = vmatpush3.msra.mxu1 %v2809_v35 }
0x1b02   :  { %2335 = vmatprep.subr.mxu1 %v2505_v0 }
0x1b03   :  { %2336 = vmatpush3.msra.mxu1 %v2816_v36 }
0x1b04   :  { %2351 = vmatprep.subr.mxu1 %v2505_v0 }
0x1bbc   :  { %v1473_v4 = vpop.f32.mrf.mxu1 }
0x1bbd   :  { %v1477_v3 = vadd.f32 %v1473_v4, %v1084_v1 }
0x1bbe   :  { %v2317_v7 = vpop.f32.mrf.mxu1 }
0x1bbf   :  { %2465 = vtanh.f32 %v1477_v3  ;;  %v2032_v6 = vmul.f32 -1.442695, %v1477_v3 }
0x1bc1   :  { %2467 = vpow2.f32 %v2032_v6 }
0x1bcc   :  { %v2466_v5 = vpop.eup %2465 }
0x1bcd   :  { %1487 = vrot.lane.b32.xlu0 %v2466_v5, %s2507_s25 }
0x1bce   :  { %v2468_v8 = vpop.eup %2467 }
0x1bcf   :  { %v1481_v9 = vadd.f32 1.0, %v2468_v8 }
0x1bd1   :  { %2469 = vrcp.f32 %v1481_v9 }
0x1bde   :  { %v2470_v11 = vpop.eup %2469 }
0x1bdf   :  { %v1485_v13 = vmul.f32 %v2470_v11, %v1395_v60 }
0x1c3f   :  { %v1488_v56 = vpop.permute.xlu0 %1487 }
0x1c40   :  { %v1490_v12 = vmul.f32 %v2470_v11, %v1488_v56 }
0x1c42   :  { %1492 = vrot.lane.b32.xlu1 %v1490_v12, %s2507_s25 }
0x1cb4   :  { %v1493_v14 = vpop.permute.xlu1 %1492 }
0x1cb5   :  { %v1495_v15 = vadd.f32 %v1493_v14, %v1485_v13  ;;  %v1104_v13 = vadd.f32 %v2899_v42, %v2852_v46  ;;  %v1905_v42 = vld [vmem:[%s3002_s7 + $0x18] sm:$0xff] }
0x1cb7   :  { %2471 = vtanh.f32 %v1495_v15 }
0x1cc4   :  { %v2472_v16 = vpop.eup %2471 }
0x1cc5   :  { %1498 = vrot.lane.b32.xlu0 %v2472_v16, %s2507_s25 }
0x1d37   :  { %v1499_v17 = vpop.permute.xlu0 %1498 }
0x1d38   :  { %v1501_v18 = vmul.f32 %v2470_v11, %v1499_v17 }
0x1d3a   :  { %1503 = vrot.lane.b32.xlu1 %v1501_v18, %s2508_s3 }
0x1dac   :  { %v1504_v20 = vpop.permute.xlu1 %1503 }
0x1dad   :  { %2327 = vmatmul.mubr.msk.f32.vlgmr.msra.gmra.mxu0 %vm183_vm2, %v1504_v20 }
0x1dae   :  { %2341 = vmatpush3.msra.mxu0 %v2796_v33  ;;  %2348 = vmatprep.mubr.msk.f32.mxu0 %vm2506_vm0, %v2505_v0 }
0x1daf   :  { %2342 = vmatprep.subr.mxu0 %v2505_v0 }
0x1db0   :  { %2343 = vmatpush3.msra.mxu0 %v2802_v34 }
0x1db1   :  { %2344 = vmatprep.subr.mxu0 %v2505_v0 }
0x1db2   :  { %2345 = vmatpush3.msra.mxu0 %v2809_v35 }
0x1db3   :  { %2346 = vmatprep.subr.mxu0 %v2505_v0 }
0x1db4   :  { %2347 = vmatpush3.msra.mxu0 %v2816_v36 }
0x1db5   :  { %2362 = vmatprep.subr.mxu0 %v2505_v0 }
0x1e6d   :  { %v1573_v21 = vpop.f32.mrf.mxu0 }
0x1e6e   :  { %v1577_v22 = vadd.f32 %v1573_v21, %v1089_v29 }
0x1e6f   :  { %v2328_v23 = vpop.f32.mrf.mxu0 }
0x1e70   :  { %2473 = vtanh.f32 %v1577_v22  ;;  %v2034_v24 = vmul.f32 -1.442695, %v1577_v22 }
0x1e72   :  { %2475 = vpow2.f32 %v2034_v24 }
0x1e7d   :  { %v2474_v53 = vpop.eup %2473 }
0x1e7e   :  { %1587 = vrot.lane.b32.xlu0 %v2474_v53, %s2507_s25 }
0x1e7f   :  { %v2476_v19 = vpop.eup %2475 }
0x1e80   :  { %v1581_v25 = vadd.f32 1.0, %v2476_v19  ;;  %v1904_v19 = vld [vmem:[%s3002_s7 + $0x10] sm:$0xff] }
0x1e82   :  { %2477 = vrcp.f32 %v1581_v25  ;;  %v1903_v25 = vld [vmem:[%s3002_s7 + $0x8] sm:$0xff] }
0x1e8f   :  { %v2478_v26 = vpop.eup %2477 }
0x1e90   :  { %v1585_v30 = vmul.f32 %v2478_v26, %v1495_v15 }
0x1ef0   :  { %v1588_v27 = vpop.permute.xlu0 %1587 }
0x1ef1   :  { %v1590_v28 = vmul.f32 %v2478_v26, %v1588_v27 }
0x1ef3   :  { %1592 = vrot.lane.b32.xlu1 %v1590_v28, %s2507_s25 }
0x1f65   :  { %v1593_v31 = vpop.permute.xlu1 %1592 }
0x1f66   :  { %v1595_v59 = vadd.f32 %v1593_v31, %v1585_v30 }
0x1f68   :  { %2479 = vtanh.f32 %v1595_v59 }
0x1f75   :  { %v2480_v32 = vpop.eup %2479 }
0x1f76   :  { %1598 = vrot.lane.b32.xlu0 %v2480_v32, %s2507_s25 }
0x1fe8   :  { %v1599_v37 = vpop.permute.xlu0 %1598 }
0x1fe9   :  { %v1601_v38 = vmul.f32 %v2478_v26, %v1599_v37  ;;  %v1902_v26 = vld [vmem:[%s3002_s7] sm:$0xff] }
0x1feb   :  { %1603 = vrot.lane.b32.xlu1 %v1601_v38, %s2508_s3 }
0x205d   :  { %v1604_v39 = vpop.permute.xlu1 %1603 }
0x205e   :  { %2338 = vmatmul.mubr.msk.f32.vlgmr.msra.gmra.mxu1 %vm183_vm2, %v1604_v39 }
0x205f   :  { %2352 = vmatpush3.msra.mxu1 %v2796_v33  ;;  %2359 = vmatprep.mubr.msk.f32.mxu1 %vm2506_vm0, %v2505_v0 }
0x2060   :  { %2353 = vmatprep.subr.mxu1 %v2505_v0 }
0x2061   :  { %2354 = vmatpush3.msra.mxu1 %v2802_v34 }
0x2062   :  { %2355 = vmatprep.subr.mxu1 %v2505_v0 }
0x2063   :  { %2356 = vmatpush3.msra.mxu1 %v2809_v35 }
0x2064   :  { %2357 = vmatprep.subr.mxu1 %v2505_v0 }
0x2065   :  { %2358 = vmatpush3.msra.mxu1 %v2816_v36 }
0x211e   :  { %v1673_v44 = vpop.f32.mrf.mxu1 }
0x211f   :  { %v1677_v33 = vadd.f32 %v1673_v44, %v1094_v41 }
0x2120   :  { %v2339_v45 = vpop.f32.mrf.mxu1 }
0x2121   :  { %2481 = vtanh.f32 %v1677_v33  ;;  %v2036_v48 = vmul.f32 -1.442695, %v1677_v33 }
0x2123   :  { %2483 = vpow2.f32 %v2036_v48 }
0x212e   :  { %v2482_v47 = vpop.eup %2481 }
0x212f   :  { %1687 = vrot.lane.b32.xlu0 %v2482_v47, %s2507_s25 }
0x2130   :  { %v2484_v34 = vpop.eup %2483 }
0x2131   :  { %v1681_v49 = vadd.f32 1.0, %v2484_v34 }
0x2133   :  { %2485 = vrcp.f32 %v1681_v49 }
0x2140   :  { %v2486_v35 = vpop.eup %2485 }
0x2141   :  { %v1685_v36 = vmul.f32 %v2486_v35, %v1595_v59  ;;  %v2041_v59 = vld [vmem:[%s3003_s8] ss:$0 sm:$0xff] }
0x21a1   :  { %v1688_v50 = vpop.permute.xlu0 %1687 }
0x21a2   :  { %v1690_v51 = vmul.f32 %v2486_v35, %v1688_v50 }
0x21a4   :  { %1692 = vrot.lane.b32.xlu1 %v1690_v51, %s2507_s25 }
0x2216   :  { %v1693_v10 = vpop.permute.xlu1 %1692 }
0x2217   :  { %v1695_v40 = vadd.f32 %v1693_v10, %v1685_v36 }
0x2219   :  { %2487 = vtanh.f32 %v1695_v40 }
0x2226   :  { %v2488_v58 = vpop.eup %2487 }
0x2227   :  { %1698 = vrot.lane.b32.xlu0 %v2488_v58, %s2507_s25 }
0x2299   :  { %v1699_v52 = vpop.permute.xlu0 %1698 }
0x229a   :  { %v1701_v54 = vmul.f32 %v2486_v35, %v1699_v52 }
0x229c   :  { %1703 = vrot.lane.b32.xlu1 %v1701_v54, %s2508_s3 }
0x230e   :  { %v1704_v55 = vpop.permute.xlu1 %1703 }
0x230f   :  { %2349 = vmatmul.mubr.msk.f32.vlgmr.msra.gmra.mxu0 %vm183_vm2, %v1704_v55 }
0x2310   :  { %2370 = vmatprep.mubr.msk.f32.mxu0 %vm2506_vm0, %v2505_v0  ;;  %2363 = vmatpush3.msra.mxu0 %v1905_v42 }
0x2311   :  { %2364 = vmatprep.subr.mxu0 %v2505_v0 }
0x2312   :  { %2365 = vmatpush3.msra.mxu0 %v1904_v19 }
0x2313   :  { %2366 = vmatprep.subr.mxu0 %v2505_v0 }
0x2314   :  { %2367 = vmatpush3.msra.mxu0 %v1903_v25 }
0x2315   :  { %2368 = vmatprep.subr.mxu0 %v2505_v0 }
0x2316   :  { %2369 = vmatpush3.msra.mxu0 %v1902_v26 }
0x23cf   :  { %v1773_v60 = vpop.f32.mrf.mxu0 }
0x23d0   :  { %v1777_v2 = vadd.f32 %v1773_v60, %v1099_v57 }
0x23d1   :  { %v2350_v61 = vpop.f32.mrf.mxu0 }
0x23d2   :  { %2489 = vtanh.f32 %v1777_v2  ;;  %v2038_v63 = vmul.f32 -1.442695, %v1777_v2 }
0x23d4   :  { %2491 = vpow2.f32 %v2038_v63 }
0x23df   :  { %v2490_v62 = vpop.eup %2489 }
0x23e0   :  { %1787 = vrot.lane.b32.xlu0 %v2490_v62, %s2507_s25 }
0x23e1   :  { %v2492_v1 = vpop.eup %2491 }
0x23e2   :  { %v1781_v4 = vadd.f32 1.0, %v2492_v1 }
0x23e4   :  { %2493 = vrcp.f32 %v1781_v4 }
0x23f1   :  { %v2494_v3 = vpop.eup %2493 }
0x23f2   :  { %v1785_v6 = vmul.f32 %v2494_v3, %v1695_v40 }
0x2452   :  { %v1788_v7 = vpop.permute.xlu0 %1787 }
0x2453   :  { %v1790_v5 = vmul.f32 %v2494_v3, %v1788_v7 }
0x2455   :  { %1792 = vrot.lane.b32.xlu1 %v1790_v5, %s2507_s25 }
0x24c7   :  { %v1793_v8 = vpop.permute.xlu1 %1792 }
0x24c8   :  { %v1795_v43 = vadd.f32 %v1793_v8, %v1785_v6 }
0x24ca   :  { %2495 = vtanh.f32 %v1795_v43 }
0x24d7   :  { %v2496_v9 = vpop.eup %2495 }
0x24d8   :  { %1798 = vrot.lane.b32.xlu0 %v2496_v9, %s2507_s25 }
0x254a   :  { %v1799_v11 = vpop.permute.xlu0 %1798 }
0x254b   :  { %v1801_v56 = vmul.f32 %v2494_v3, %v1799_v11 }
0x254d   :  { %1803 = vrot.lane.b32.xlu1 %v1801_v56, %s2508_s3 }
0x25bf   :  { %v1804_v12 = vpop.permute.xlu1 %1803 }
0x25c0   :  { %2360 = vmatmul.mubr.msk.f32.vlgmr.msra.gmra.mxu1 %vm183_vm2, %v1804_v12 }
0x2680   :  { %v1873_v14 = vpop.f32.mrf.mxu1 }
0x2681   :  { %v1877_v15 = vadd.f32 %v1873_v14, %v1104_v13 }
0x2682   :  { %v2361_v16 = vpop.f32.mrf.mxu1 }
0x2683   :  { %2497 = vtanh.f32 %v1877_v15  ;;  %v2040_v18 = vmul.f32 -1.442695, %v1877_v15 }
0x2685   :  { %2499 = vpow2.f32 %v2040_v18 }
0x2690   :  { %v2498_v17 = vpop.eup %2497 }
0x2691   :  { %1887 = vrot.lane.b32.xlu0 %v2498_v17, %s2507_s25 }
0x2692   :  { %v2500_v20 = vpop.eup %2499 }
0x2693   :  { %v1881_v29 = vadd.f32 1.0, %v2500_v20 }
0x2695   :  { %2501 = vrcp.f32 %v1881_v29 }
0x26a2   :  { %v2502_v21 = vpop.eup %2501 }
0x26a3   :  { %v1885_v53 = vmul.f32 %v2502_v21, %v1795_v43 }
0x2703   :  { %v1888_v22 = vpop.permute.xlu0 %1887 }
0x2704   :  { %v1890_v23 = vmul.f32 %v2502_v21, %v1888_v22 }
0x2706   :  { %1892 = vrot.lane.b32.xlu1 %v1890_v23, %s2507_s25 }
0x2778   :  { %v1893_v24 = vpop.permute.xlu1 %1892 }
0x2779   :  { %v1895_v46 = vadd.f32 %v1893_v24, %v1885_v53 }
0x277b   :  { %2503 = vtanh.f32 %v1895_v46 }
0x2788   :  { %v2504_v27 = vpop.eup %2503 }
0x2789   :  { %1898 = vrot.lane.b32.xlu0 %v2504_v27, %s2507_s25 }
0x27fb   :  { %v1899_v28 = vpop.permute.xlu0 %1898 }
0x27fc   :  { %v1901_v30 = vmul.f32 %v2502_v21, %v1899_v28 }
0x27fe   :  { %1914 = vrot.lane.b32.xlu1 %v1901_v30, %s2508_s3 }
0x2870   :  { %v1915_v31 = vpop.permute.xlu1 %1914 }
0x2871   :  { %2371 = vmatmul.mubr.msk.f32.vlgmr.msra.gmra.mxu0 %vm183_vm2, %v1915_v31 }
0x2931   :  { %v1984_v32 = vpop.f32.mrf.mxu0 }
0x2932   :  { %v1985_v37 = vadd.f32 %v2041_v59, %v1984_v32 }
0x2933   :  { %v2372_v38 = vpop.f32.mrf.mxu0 }
0x2934   :  { %1988 = vst [vmem:[%s3004_s9] sm:$0xff] %v1985_v37 }

</bundles_post_ra>
